<compile_context>
chip_gen: v7x
topology: tpu7x:2x2x1
jax: 0.10.0
libtpu: 0.0.40
codegen_flags: <defaults>
</compile_context>

<pallas_src>
import functools
import math

import jax
import jax.numpy as jnp
from jax import lax
from jax.experimental import pallas as pl
from jax.experimental.pallas import tpu as pltpu


def _gelu_tanh(x):
    # GELU with tanh approximation (matches nn.GELU(approximate='tanh'))
    return 0.5 * x * (1.0 + jnp.tanh(0.7978845608028654 * (x + 0.044715 * x * x * x)))


def _layernorm(x, w, b, eps=1e-5):
    mu = jnp.mean(x, axis=-1, keepdims=True)
    var = jnp.mean((x - mu) ** 2, axis=-1, keepdims=True)
    return (x - mu) * lax.rsqrt(var + eps) * w + b


def block_kernel(x_ref, vec_ref, bqkv_ref, bfc_ref,
                 wqkv_ref, wpr_ref, wfc_ref, wpr2_ref,
                 out_ref,
                 k_s, v_s, q_s, attn_s, res_s, mlp_s,
                 *, n_head, TQ, mlp_cs):
    qi = pl.program_id(1)
    T, C = x_ref.shape[1], x_ref.shape[2]
    hd = C // n_head
    n_q = T // TQ
    n_mlp = (4 * C) // mlp_cs

    # Packed f32 vectors: [ln1_w, ln1_b, ln2_w, ln2_b, attn-proj bias, mlp-proj bias]
    ln1w, ln1b = vec_ref[0:1, :], vec_ref[1:2, :]
    ln2w, ln2b = vec_ref[2:3, :], vec_ref[3:4, :]
    b_atp, b_mlp = vec_ref[4:5, :], vec_ref[5:6, :]

    # ---- K / V for the whole sequence: computed once per batch element -----
    # Row-tiled so the f32 live window is only (TQ, C) at a time.
    @pl.when(qi == 0)
    def _():
        for r in range(n_q):                             # static row-tile loop
            rsl = slice(r * TQ, (r + 1) * TQ)
            h1r = _layernorm(x_ref[0, rsl, :].astype(jnp.float32),
                             ln1w, ln1b).astype(jnp.bfloat16)
            k_s[rsl, :] = (
                jnp.dot(h1r, wqkv_ref[:, C:2 * C],
                        preferred_element_type=jnp.float32)
                + bqkv_ref[:, C:2 * C]).astype(jnp.bfloat16)
            v_s[rsl, :] = (
                jnp.dot(h1r, wqkv_ref[:, 2 * C:],
                        preferred_element_type=jnp.float32)
                + bqkv_ref[:, 2 * C:]).astype(jnp.bfloat16)

    # ---- current query tile -------------------------------------------------
    q0 = pl.multiple_of(qi * TQ, TQ)
    x_t = x_ref[0, pl.ds(q0, TQ), :].astype(jnp.float32)           # (TQ, C) f32
    h1 = _layernorm(x_t, ln1w, ln1b).astype(jnp.bfloat16)
    # Q projection for this tile (1/sqrt(hd) pre-folded into W_q / b_q on host).
    q_s[...] = (jnp.dot(h1, wqkv_ref[:, 0:C],
                        preferred_element_type=jnp.float32)
                + bqkv_ref[:, 0:C]).astype(jnp.bfloat16)

    # Causal mask for this (TQ, T) score tile from small iotas (no (T,T) iota).
    row_idx = q0 + lax.broadcasted_iota(jnp.int32, (TQ, 1), 0)
    col_idx = lax.broadcasted_iota(jnp.int32, (1, T), 1)
    causal = col_idx <= row_idx                                    # (TQ, T) bool

    # ---- causal self-attention, one head at a time --------------------------
    for h in range(n_head):
        lo = h * hd
        q_h = q_s[:, lo:lo + hd]                                   # (TQ, hd) bf16
        k_h = k_s[:, lo:lo + hd]                                   # (T,  hd) bf16
        v_h = v_s[:, lo:lo + hd]
        # Contract the last dims of both operands -> no k.T materialization.
        s = lax.dot_general(q_h, k_h, (((1,), (1,)), ((), ())),
                            preferred_element_type=jnp.float32)    # (TQ, T) f32
        s = jnp.where(causal, s, -1e30)
        mx = jnp.max(s, axis=-1, keepdims=True)
        p = jnp.exp(s - mx)                                        # unnormalized
        l = jnp.sum(p, axis=-1, keepdims=True)
        o_h = jnp.dot(p.astype(jnp.bfloat16), v_h,
                      preferred_element_type=jnp.float32)          # (TQ, hd)
        o_h = o_h / l                                              # exact softmax norm
        attn_s[:, lo:lo + hd] = o_h.astype(jnp.bfloat16)

    # Fused attention output projection (full contraction depth C).
    y = jnp.dot(attn_s[...], wpr_ref[...], preferred_element_type=jnp.float32)
    res_s[...] = x_t + y + b_atp                                   # residual 1 (f32)

    # ---- ln_2 + MLP with lane-aligned hidden-dim chunks ----------------------
    attn_s[...] = _layernorm(res_s[...], ln2w, ln2b).astype(jnp.bfloat16)  # reuse as h2
    for j in range(n_mlp):
        lo = j * mlp_cs
        f = (jnp.dot(attn_s[...], wfc_ref[:, lo:lo + mlp_cs],
                     preferred_element_type=jnp.float32)
             + bfc_ref[:, lo:lo + mlp_cs])
        mlp_s[:, lo:lo + mlp_cs] = _gelu_tanh(f).astype(jnp.bfloat16)
    m2 = jnp.dot(mlp_s[...], wpr2_ref[...], preferred_element_type=jnp.float32)

    out_ref[0] = (res_s[...] + m2 + b_mlp).astype(out_ref.dtype)   # residual 2


# ----------------------------- wrapper --------------------------------------
def _pick_tile(total, cap):
    if total <= cap:
        return total
    for c in range(cap, 0, -1):
        if total % c == 0:
            return c
    return total


def _tpu_vmem_capacity_bytes():
    try:
        info = pltpu.get_tpu_info()
        for name in ("vmem_capacity_bytes", "vmem_size_bytes", "vmem_bytes"):
            val = getattr(info, name, None)
            if val:
                return int(val)
    except Exception:
        pass
    return 64 * 1024 * 1024          # conservative fallback (v7x per-TC VMEM)


def _vmem_limit_bytes(T, C, TQ, mlp_cs, itemsize, single_buffer_weights):
    bf16, f32 = 2, 4
    wbuf = 1 if single_buffer_weights else 2
    weight_bytes = wbuf * (12 * C * C * bf16 + 13 * C * f32)
    io_bytes = 2 * T * C * itemsize + 2 * TQ * C * itemsize   # x block + out block (x2 buffers)
    scratch_bytes = (2 * T * C + 2 * TQ * C + TQ * 4 * C) * bf16 + TQ * C * f32
    temp_bytes = (3 * TQ * T + 2 * TQ * mlp_cs + 8 * TQ * C) * f32
    est = int(1.3 * (weight_bytes + io_bytes + scratch_bytes + temp_bytes))
    budget = int(0.8 * _tpu_vmem_capacity_bytes())            # ~20% headroom
    return max(16 * 1024 * 1024, min(est, budget))


def _build_block_call(B, T, C, x_dtype, n_head, TQ, mlp_cs, single_buffer_weights):
    n_q = T // TQ
    const_kwargs = {}
    if single_buffer_weights:
        # Grid-invariant operands never change block index -> the default 2nd
        # pipeline buffer is pure VMEM waste.
        const_kwargs = dict(pipeline_mode=pl.Buffered(1))

    def const_spec(shape):
        return pl.BlockSpec(shape, lambda b, qi: (0,) * len(shape), **const_kwargs)

    grid_spec = pltpu.PrefetchScalarGridSpec(
        num_scalar_prefetch=0,
        grid=(B, n_q),
        in_specs=[
            pl.BlockSpec((1, T, C), lambda b, qi: (b, 0, 0)),  # x: full seq per batch elem
            const_spec((6, C)),                                 # packed LN weights + proj biases
            const_spec((1, 3 * C)),                             # fused qkv bias (Q pre-scaled)
            const_spec((1, 4 * C)),                             # mlp c_fc bias
            const_spec((C, 3 * C)),                             # fused qkv weight (bf16)
            const_spec((C, C)),                                 # attn out-proj weight (bf16)
            const_spec((C, 4 * C)),                             # mlp c_fc weight (bf16)
            const_spec((4 * C, C)),                             # mlp c_proj weight (bf16)
        ],
        out_specs=pl.BlockSpec((1, TQ, C), lambda b, qi: (b, qi, 0)),
        scratch_shapes=[
            pltpu.VMEM((T, C), jnp.bfloat16),        # K (full sequence)
            pltpu.VMEM((T, C), jnp.bfloat16),        # V (full sequence)
            pltpu.VMEM((TQ, C), jnp.bfloat16),       # Q tile
            pltpu.VMEM((TQ, C), jnp.bfloat16),       # per-head attn outputs / ln_2 acts
            pltpu.VMEM((TQ, C), jnp.float32),        # residual-1 tile (f32)
            pltpu.VMEM((TQ, 4 * C), jnp.bfloat16),   # GELU activations
        ],
    )
    kernel = functools.partial(block_kernel, n_head=n_head, TQ=TQ, mlp_cs=mlp_cs)
    return pl.pallas_call(
        kernel,
        out_shape=jax.ShapeDtypeStruct((B, T, C), x_dtype),
        grid_spec=grid_spec,
        compiler_params=pltpu.CompilerParams(
            # Batch axis can be split across TensorCores; the query-tile axis
            # carries the K/V scratch (written at qi==0), so it is "arbitrary".
            dimension_semantics=("parallel", "arbitrary"),
            vmem_limit_bytes=_vmem_limit_bytes(
                T, C, TQ, mlp_cs, jnp.dtype(x_dtype).itemsize,
                single_buffer_weights)),
    )


def block_forward(x, params, n_head, tq=256):
    B, T, C = x.shape
    TQ = _pick_tile(T, tq)            # query tile
    mlp_cs = _pick_tile(4 * C, 512)   # MLP hidden-dim chunk
    # Prefer single-buffered grid-invariant weights; fall back transparently if
    # this JAX/Mosaic build rejects pipeline_mode=pl.Buffered(1).
    try:
        return _build_block_call(B, T, C, x.dtype, n_head, TQ, mlp_cs, True)(x, *params)
    except Exception:
        return _build_block_call(B, T, C, x.dtype, n_head, TQ, mlp_cs, False)(x, *params)


# ----------------------- parameter construction ----------------------------
def init_params(key, C, n_head):
    hd = C // n_head
    ks = jax.random.split(key, 8)
    std = 0.02
    # PyTorch-convention weights: Linear weight is (out_features, in_features)
    W_attn = jax.random.normal(ks[0], (3 * C, C), jnp.float32) * std
    b_attn = jax.random.normal(ks[1], (3 * C,), jnp.float32) * std
    W_proj = jax.random.normal(ks[2], (C, C), jnp.float32) * std
    b_proj = jax.random.normal(ks[3], (C,), jnp.float32) * std
    W_fc = jax.random.normal(ks[4], (4 * C, C), jnp.float32) * std
    b_fc = jax.random.normal(ks[5], (4 * C,), jnp.float32) * std
    W_proj2 = jax.random.normal(ks[6], (C, 4 * C), jnp.float32) * std
    b_proj2 = jax.random.normal(ks[7], (C,), jnp.float32) * std
    ln1_w = jnp.ones((C,), jnp.float32)
    ln1_b = jnp.zeros((C,), jnp.float32)
    ln2_w = jnp.ones((C,), jnp.float32)
    ln2_b = jnp.zeros((C,), jnp.float32)

    torch_params = dict(W_attn=W_attn, b_attn=b_attn, W_proj=W_proj, b_proj=b_proj,
                        W_fc=W_fc, b_fc=b_fc, W_proj2=W_proj2, b_proj2=b_proj2,
                        ln1_w=ln1_w, ln1_b=ln1_b, ln2_w=ln2_w, ln2_b=ln2_b)

    # Kernel-layout weights: y = x @ W.T + b -> pre-transpose; fuse QKV; fold
    # the 1/sqrt(hd) attention scale into the Q weight/bias (f32, then bf16).
    scale = 1.0 / math.sqrt(hd)
    w_qkv = W_attn.T                                     # (C, 3C), cols = [Q|K|V]
    w_qkv = w_qkv.at[:, :C].multiply(scale)
    b_qkv = b_attn.at[:C].multiply(scale).reshape(1, 3 * C)

    vec_slab = jnp.stack([ln1_w, ln1_b, ln2_w, ln2_b, b_proj, b_proj2], axis=0)  # (6, C)

    kernel_params = (
        vec_slab,                                        # (6, C) f32
        b_qkv,                                           # (1, 3C) f32
        b_fc.reshape(1, 4 * C),                          # (1, 4C) f32
        w_qkv.astype(jnp.bfloat16),                      # (C, 3C)
        W_proj.T.astype(jnp.bfloat16),                   # (C, C)
        W_fc.T.astype(jnp.bfloat16),                     # (C, 4C)
        W_proj2.T.astype(jnp.bfloat16),                  # (4C, C)
    )
    return torch_params, kernel_params


# ----------------------- pure-JAX reference (PyTorch semantics) -------------
def ref_block(x, p, n_head):
    B, T, C = x.shape
    hd = C // n_head

    def ln(x, w, b):
        mu = jnp.mean(x, axis=-1, keepdims=True)
        var = jnp.mean((x - mu) ** 2, axis=-1, keepdims=True)
        return (x - mu) / jnp.sqrt(var + 1e-5) * w + b

    h = ln(x, p["ln1_w"], p["ln1_b"])
    qkv = h @ p["W_attn"].T + p["b_attn"]
    q, k, v = jnp.split(qkv, 3, axis=-1)
    q = q.reshape(B, T, n_head, hd).transpose(0, 2, 1, 3)
    k = k.reshape(B, T, n_head, hd).transpose(0, 2, 1, 3)
    v = v.reshape(B, T, n_head, hd).transpose(0, 2, 1, 3)
    s = jnp.einsum("bhqd,bhkd->bhqk", q, k) / math.sqrt(hd)
    mask = jnp.tril(jnp.ones((T, T), bool))
    s = jnp.where(mask, s, -jnp.inf)
    att = jax.nn.softmax(s, axis=-1)
    y = jnp.einsum("bhqk,bhkd->bhqd", att, v).transpose(0, 2, 1, 3).reshape(B, T, C)
    y = y @ p["W_proj"].T + p["b_proj"]
    x = x + y

    h2 = ln(x, p["ln2_w"], p["ln2_b"])
    f = h2 @ p["W_fc"].T + p["b_fc"]
    f = 0.5 * f * (1.0 + jnp.tanh(0.7978845608028654 * (f + 0.044715 * f ** 3)))
    m = f @ p["W_proj2"].T + p["b_proj2"]
    return x + m


if __name__ == "__main__":
    B, T, C, n_head = 2, 8, 32, 4
    key = jax.random.PRNGKey(0)
    kx, kp = jax.random.split(key)
    x = jax.random.normal(kx, (B, T, C), jnp.float32)
    torch_params, kernel_params = init_params(kp, C, n_head)

    out = block_forward(x, kernel_params, n_head)
    out = jax.block_until_ready(out)

    ref = ref_block(x, torch_params, n_head)
    assert out.shape == (B, T, C)
    err = float(jnp.max(jnp.abs(out - ref)))
    # bf16 matmul operands (f32 accumulation) -> loosened tolerance vs f32 ref.
    assert jnp.allclose(out, ref, rtol=2e-2, atol=2e-2), err
    print("KERNEL_OK")
</pallas_src>

<mosaic_0001>
module attributes {stable_mosaic.version = 11 : i64} {
  func.func @block_kernel(%arg0: i32, %arg1: i32, %arg2: memref<1x8x32xf32, #tpu.memory_space<vmem>>, %arg3: memref<6x32xf32, #tpu.memory_space<vmem>>, %arg4: memref<1x96xf32, #tpu.memory_space<vmem>>, %arg5: memref<1x128xf32, #tpu.memory_space<vmem>>, %arg6: memref<32x96xbf16, #tpu.memory_space<vmem>>, %arg7: memref<32x32xbf16, #tpu.memory_space<vmem>>, %arg8: memref<32x128xbf16, #tpu.memory_space<vmem>>, %arg9: memref<128x32xbf16, #tpu.memory_space<vmem>>, %arg10: memref<1x8x32xf32, #tpu.memory_space<vmem>>, %arg11: memref<8x32xbf16, #tpu.memory_space<vmem>>, %arg12: memref<8x32xbf16, #tpu.memory_space<vmem>>, %arg13: memref<8x32xbf16, #tpu.memory_space<vmem>>, %arg14: memref<8x32xbf16, #tpu.memory_space<vmem>>, %arg15: memref<8x32xf32, #tpu.memory_space<vmem>>, %arg16: memref<8x128xbf16, #tpu.memory_space<vmem>>) attributes {dimension_semantics = [#tpu.dimension_semantics<parallel>, #tpu.dimension_semantics<arbitrary>], iteration_bounds = array<i64: 2, 1>, scalar_prefetch = 0 : i64, scratch_operands = 6 : i64, tpu.core_type = #tpu.core_type<tc>, window_params = [{transform_indices = @transform_0, window_bounds = array<i64: 1, 8, 32>}, {pipeline_mode = #tpu.pipeline_mode<synchronous>, transform_indices = @transform_1, window_bounds = array<i64: 6, 32>}, {pipeline_mode = #tpu.pipeline_mode<synchronous>, transform_indices = @transform_2, window_bounds = array<i64: 1, 96>}, {pipeline_mode = #tpu.pipeline_mode<synchronous>, transform_indices = @transform_3, window_bounds = array<i64: 1, 128>}, {pipeline_mode = #tpu.pipeline_mode<synchronous>, transform_indices = @transform_4, window_bounds = array<i64: 32, 96>}, {pipeline_mode = #tpu.pipeline_mode<synchronous>, transform_indices = @transform_5, window_bounds = array<i64: 32, 32>}, {pipeline_mode = #tpu.pipeline_mode<synchronous>, transform_indices = @transform_6, window_bounds = array<i64: 32, 128>}, {pipeline_mode = #tpu.pipeline_mode<synchronous>, transform_indices = @transform_7, window_bounds = array<i64: 128, 32>}, {transform_indices = @transform_8, window_bounds = array<i64: 1, 8, 32>}]} {
    %c0 = arith.constant 0 : index
    %c0_0 = arith.constant 0 : index
    %0 = vector.load %arg3[%c0, %c0_0] : memref<6x32xf32, #tpu.memory_space<vmem>>, vector<1x32xf32>
    %c1 = arith.constant 1 : index
    %c0_1 = arith.constant 0 : index
    %1 = vector.load %arg3[%c1, %c0_1] : memref<6x32xf32, #tpu.memory_space<vmem>>, vector<1x32xf32>
    %c2 = arith.constant 2 : index
    %c0_2 = arith.constant 0 : index
    %2 = vector.load %arg3[%c2, %c0_2] : memref<6x32xf32, #tpu.memory_space<vmem>>, vector<1x32xf32>
    %c3 = arith.constant 3 : index
    %c0_3 = arith.constant 0 : index
    %3 = vector.load %arg3[%c3, %c0_3] : memref<6x32xf32, #tpu.memory_space<vmem>>, vector<1x32xf32>
    %c4 = arith.constant 4 : index
    %c0_4 = arith.constant 0 : index
    %4 = vector.load %arg3[%c4, %c0_4] : memref<6x32xf32, #tpu.memory_space<vmem>>, vector<1x32xf32>
    %c5 = arith.constant 5 : index
    %c0_5 = arith.constant 0 : index
    %5 = vector.load %arg3[%c5, %c0_5] : memref<6x32xf32, #tpu.memory_space<vmem>>, vector<1x32xf32>
    %c0_i32 = arith.constant 0 : i32
    %6 = arith.cmpi eq, %arg1, %c0_i32 : i32
    %7 = arith.extui %6 : i1 to i32
    %c0_i32_6 = arith.constant 0 : i32
    %8 = arith.cmpi ne, %7, %c0_i32_6 : i32
    scf.if %8 {
      %c0_108 = arith.constant 0 : index
      %c0_109 = arith.constant 0 : index
      %c0_110 = arith.constant 0 : index
      %190 = vector.load %arg2[%c0_108, %c0_109, %c0_110] : memref<1x8x32xf32, #tpu.memory_space<vmem>>, vector<1x8x32xf32>
      %191 = vector.shape_cast %190 : vector<1x8x32xf32> to vector<8x32xf32>
      %cst_111 = arith.constant dense<0.000000e+00> : vector<8xf32>
      %192 = vector.multi_reduction <add>, %191, %cst_111 [1] : vector<8x32xf32> to vector<8xf32>
      %193 = vector.shape_cast %192 : vector<8xf32> to vector<8x1xf32>
      %cst_112 = arith.constant 3.200000e+01 : f32
      %194 = vector.broadcast %cst_112 : f32 to vector<8x1xf32>
      %195 = arith.divf %193, %194 : vector<8x1xf32>
      %196 = vector.broadcast %195 : vector<8x1xf32> to vector<8x32xf32>
      %197 = arith.subf %191, %196 : vector<8x32xf32>
      %198 = arith.mulf %197, %197 : vector<8x32xf32>
      %cst_113 = arith.constant dense<0.000000e+00> : vector<8xf32>
      %199 = vector.multi_reduction <add>, %198, %cst_113 [1] : vector<8x32xf32> to vector<8xf32>
      %200 = vector.shape_cast %199 : vector<8xf32> to vector<8x1xf32>
      %cst_114 = arith.constant 3.200000e+01 : f32
      %201 = vector.broadcast %cst_114 : f32 to vector<8x1xf32>
      %202 = arith.divf %200, %201 : vector<8x1xf32>
      %203 = vector.broadcast %195 : vector<8x1xf32> to vector<8x32xf32>
      %204 = arith.subf %191, %203 : vector<8x32xf32>
      %cst_115 = arith.constant 9.99999974E-6 : f32
      %205 = vector.broadcast %cst_115 : f32 to vector<8x1xf32>
      %206 = arith.addf %202, %205 : vector<8x1xf32>
      %207 = math.rsqrt %206 : vector<8x1xf32>
      %208 = vector.broadcast %207 : vector<8x1xf32> to vector<8x32xf32>
      %209 = arith.mulf %204, %208 : vector<8x32xf32>
      %210 = vector.broadcast %0 : vector<1x32xf32> to vector<8x32xf32>
      %211 = arith.mulf %209, %210 : vector<8x32xf32>
      %212 = vector.broadcast %1 : vector<1x32xf32> to vector<8x32xf32>
      %213 = arith.addf %211, %212 : vector<8x32xf32>
      %214 = arith.truncf %213 : vector<8x32xf32> to vector<8x32xbf16>
      %c0_116 = arith.constant 0 : index
      %c32 = arith.constant 32 : index
      %215 = vector.load %arg6[%c0_116, %c32] : memref<32x96xbf16, #tpu.memory_space<vmem>>, vector<32x32xbf16>
      %cst_117 = arith.constant dense<0.000000e+00> : vector<8x32xf32>
      %216 = tpu.matmul %214, %215, %cst_117 {dimension_numbers = #tpu.dot_dimension_numbers<[1], [0], [0], [1], [0, 0, 1, 1], [], []>} : vector<8x32xbf16>, vector<32x32xbf16>, vector<8x32xf32> -> vector<8x32xf32>
      %c0_118 = arith.constant 0 : index
      %c32_119 = arith.constant 32 : index
      %217 = vector.load %arg4[%c0_118, %c32_119] : memref<1x96xf32, #tpu.memory_space<vmem>>, vector<1x32xf32>
      %218 = vector.broadcast %217 : vector<1x32xf32> to vector<8x32xf32>
      %219 = arith.addf %216, %218 : vector<8x32xf32>
      %220 = arith.truncf %219 : vector<8x32xf32> to vector<8x32xbf16>
      %c0_120 = arith.constant 0 : index
      %c0_121 = arith.constant 0 : index
      %221 = vector.load %arg11[%c0_120, %c0_121] : memref<8x32xbf16, #tpu.memory_space<vmem>>, vector<8x32xbf16>
      tpu.vector_store %arg11[%c0_120, %c0_121], %220 {strides = array<i32>} : memref<8x32xbf16, #tpu.memory_space<vmem>>, vector<8x32xbf16>,
      %c0_122 = arith.constant 0 : index
      %c64 = arith.constant 64 : index
      %222 = vector.load %arg6[%c0_122, %c64] : memref<32x96xbf16, #tpu.memory_space<vmem>>, vector<32x32xbf16>
      %cst_123 = arith.constant dense<0.000000e+00> : vector<8x32xf32>
      %223 = tpu.matmul %214, %222, %cst_123 {dimension_numbers = #tpu.dot_dimension_numbers<[1], [0], [0], [1], [0, 0, 1, 1], [], []>} : vector<8x32xbf16>, vector<32x32xbf16>, vector<8x32xf32> -> vector<8x32xf32>
      %c0_124 = arith.constant 0 : index
      %c64_125 = arith.constant 64 : index
      %224 = vector.load %arg4[%c0_124, %c64_125] : memref<1x96xf32, #tpu.memory_space<vmem>>, vector<1x32xf32>
      %225 = vector.broadcast %224 : vector<1x32xf32> to vector<8x32xf32>
      %226 = arith.addf %223, %225 : vector<8x32xf32>
      %227 = arith.truncf %226 : vector<8x32xf32> to vector<8x32xbf16>
      %c0_126 = arith.constant 0 : index
      %c0_127 = arith.constant 0 : index
      %228 = vector.load %arg12[%c0_126, %c0_127] : memref<8x32xbf16, #tpu.memory_space<vmem>>, vector<8x32xbf16>
      tpu.vector_store %arg12[%c0_126, %c0_127], %227 {strides = array<i32>} : memref<8x32xbf16, #tpu.memory_space<vmem>>, vector<8x32xbf16>,
    } else {
    }
    %c8_i32 = arith.constant 8 : i32
    %9 = arith.muli %arg1, %c8_i32 : i32
    %10 = tpu.assume_multiple %9, 8 : i32
    %c0_7 = arith.constant 0 : index
    %11 = arith.index_cast %10 : i32 to index
    %c0_8 = arith.constant 0 : index
    %12 = vector.load %arg2[%c0_7, %11, %c0_8] : memref<1x8x32xf32, #tpu.memory_space<vmem>>, vector<1x8x32xf32>
    %13 = vector.shape_cast %12 : vector<1x8x32xf32> to vector<8x32xf32>
    %cst = arith.constant dense<0.000000e+00> : vector<8xf32>
    %14 = vector.multi_reduction <add>, %13, %cst [1] : vector<8x32xf32> to vector<8xf32>
    %15 = vector.shape_cast %14 : vector<8xf32> to vector<8x1xf32>
    %cst_9 = arith.constant 3.200000e+01 : f32
    %16 = vector.broadcast %cst_9 : f32 to vector<8x1xf32>
    %17 = arith.divf %15, %16 : vector<8x1xf32>
    %18 = vector.broadcast %17 : vector<8x1xf32> to vector<8x32xf32>
    %19 = arith.subf %13, %18 : vector<8x32xf32>
    %20 = arith.mulf %19, %19 : vector<8x32xf32>
    %cst_10 = arith.constant dense<0.000000e+00> : vector<8xf32>
    %21 = vector.multi_reduction <add>, %20, %cst_10 [1] : vector<8x32xf32> to vector<8xf32>
    %22 = vector.shape_cast %21 : vector<8xf32> to vector<8x1xf32>
    %cst_11 = arith.constant 3.200000e+01 : f32
    %23 = vector.broadcast %cst_11 : f32 to vector<8x1xf32>
    %24 = arith.divf %22, %23 : vector<8x1xf32>
    %25 = vector.broadcast %17 : vector<8x1xf32> to vector<8x32xf32>
    %26 = arith.subf %13, %25 : vector<8x32xf32>
    %cst_12 = arith.constant 9.99999974E-6 : f32
    %27 = vector.broadcast %cst_12 : f32 to vector<8x1xf32>
    %28 = arith.addf %24, %27 : vector<8x1xf32>
    %29 = math.rsqrt %28 : vector<8x1xf32>
    %30 = vector.broadcast %29 : vector<8x1xf32> to vector<8x32xf32>
    %31 = arith.mulf %26, %30 : vector<8x32xf32>
    %32 = vector.broadcast %0 : vector<1x32xf32> to vector<8x32xf32>
    %33 = arith.mulf %31, %32 : vector<8x32xf32>
    %34 = vector.broadcast %1 : vector<1x32xf32> to vector<8x32xf32>
    %35 = arith.addf %33, %34 : vector<8x32xf32>
    %36 = arith.truncf %35 : vector<8x32xf32> to vector<8x32xbf16>
    %c0_13 = arith.constant 0 : index
    %c0_14 = arith.constant 0 : index
    %37 = vector.load %arg6[%c0_13, %c0_14] : memref<32x96xbf16, #tpu.memory_space<vmem>>, vector<32x32xbf16>
    %cst_15 = arith.constant dense<0.000000e+00> : vector<8x32xf32>
    %38 = tpu.matmul %36, %37, %cst_15 {dimension_numbers = #tpu.dot_dimension_numbers<[1], [0], [0], [1], [0, 0, 1, 1], [], []>} : vector<8x32xbf16>, vector<32x32xbf16>, vector<8x32xf32> -> vector<8x32xf32>
    %c0_16 = arith.constant 0 : index
    %c0_17 = arith.constant 0 : index
    %39 = vector.load %arg4[%c0_16, %c0_17] : memref<1x96xf32, #tpu.memory_space<vmem>>, vector<1x32xf32>
    %40 = vector.broadcast %39 : vector<1x32xf32> to vector<8x32xf32>
    %41 = arith.addf %38, %40 : vector<8x32xf32>
    %42 = arith.truncf %41 : vector<8x32xf32> to vector<8x32xbf16>
    %c0_18 = arith.constant 0 : index
    %c0_19 = arith.constant 0 : index
    %43 = vector.load %arg13[%c0_18, %c0_19] : memref<8x32xbf16, #tpu.memory_space<vmem>>, vector<8x32xbf16>
    tpu.vector_store %arg13[%c0_18, %c0_19], %42 {strides = array<i32>} : memref<8x32xbf16, #tpu.memory_space<vmem>>, vector<8x32xbf16>,
    %44 = tpu.iota {dimensions = array<i32: 0>} : vector<8x1xi32>
    %45 = vector.broadcast %10 : i32 to vector<8x1xi32>
    %46 = arith.addi %45, %44 : vector<8x1xi32>
    %47 = tpu.iota {dimensions = array<i32: 1>} : vector<1x8xi32>
    %48 = vector.broadcast %47 : vector<1x8xi32> to vector<8x8xi32>
    %49 = vector.broadcast %46 : vector<8x1xi32> to vector<8x8xi32>
    %50 = arith.cmpi sle, %48, %49 : vector<8x8xi32>
    %c0_20 = arith.constant 0 : index
    %c0_21 = arith.constant 0 : index
    %51 = vector.load %arg13[%c0_20, %c0_21] : memref<8x32xbf16, #tpu.memory_space<vmem>>, vector<8x8xbf16>
    %c0_22 = arith.constant 0 : index
    %c0_23 = arith.constant 0 : index
    %52 = vector.load %arg11[%c0_22, %c0_23] : memref<8x32xbf16, #tpu.memory_space<vmem>>, vector<8x8xbf16>
    %c0_24 = arith.constant 0 : index
    %c0_25 = arith.constant 0 : index
    %53 = vector.load %arg12[%c0_24, %c0_25] : memref<8x32xbf16, #tpu.memory_space<vmem>>, vector<8x8xbf16>
    %cst_26 = arith.constant dense<0.000000e+00> : vector<8x8xf32>
    %54 = tpu.matmul %51, %52, %cst_26 {dimension_numbers = #tpu.dot_dimension_numbers<[1], [1], [0], [0], [0, 0, 1, 0], [], []>} : vector<8x8xbf16>, vector<8x8xbf16>, vector<8x8xf32> -> vector<8x8xf32>
    %cst_27 = arith.constant -1.000000e+30 : f32
    %55 = vector.broadcast %cst_27 : f32 to vector<8x8xf32>
    %56 = arith.select %50, %54, %55 : vector<8x8xi1>, vector<8x8xf32>
    %cst_28 = arith.constant dense<0xFF800000> : vector<8xf32>
    %57 = vector.multi_reduction <maximumf>, %56, %cst_28 [1] : vector<8x8xf32> to vector<8xf32>
    %58 = vector.shape_cast %57 : vector<8xf32> to vector<8x1xf32>
    %59 = vector.broadcast %58 : vector<8x1xf32> to vector<8x8xf32>
    %60 = arith.subf %56, %59 : vector<8x8xf32>
    %61 = math.exp %60 : vector<8x8xf32>
    %cst_29 = arith.constant dense<0.000000e+00> : vector<8xf32>
    %62 = vector.multi_reduction <add>, %61, %cst_29 [1] : vector<8x8xf32> to vector<8xf32>
    %63 = vector.shape_cast %62 : vector<8xf32> to vector<8x1xf32>
    %64 = arith.truncf %61 : vector<8x8xf32> to vector<8x8xbf16>
    %cst_30 = arith.constant dense<0.000000e+00> : vector<8x8xf32>
    %65 = tpu.matmul %64, %53, %cst_30 {dimension_numbers = #tpu.dot_dimension_numbers<[1], [0], [0], [1], [0, 0, 1, 1], [], []>} : vector<8x8xbf16>, vector<8x8xbf16>, vector<8x8xf32> -> vector<8x8xf32>
    %66 = vector.broadcast %63 : vector<8x1xf32> to vector<8x8xf32>
    %67 = arith.divf %65, %66 : vector<8x8xf32>
    %68 = arith.truncf %67 : vector<8x8xf32> to vector<8x8xbf16>
    %c0_31 = arith.constant 0 : index
    %c0_32 = arith.constant 0 : index
    %69 = vector.load %arg14[%c0_31, %c0_32] : memref<8x32xbf16, #tpu.memory_space<vmem>>, vector<8x8xbf16>
    tpu.vector_store %arg14[%c0_31, %c0_32], %68 {strides = array<i32>} : memref<8x32xbf16, #tpu.memory_space<vmem>>, vector<8x8xbf16>,
    %c0_33 = arith.constant 0 : index
    %c8 = arith.constant 8 : index
    %70 = vector.load %arg13[%c0_33, %c8] : memref<8x32xbf16, #tpu.memory_space<vmem>>, vector<8x8xbf16>
    %c0_34 = arith.constant 0 : index
    %c8_35 = arith.constant 8 : index
    %71 = vector.load %arg11[%c0_34, %c8_35] : memref<8x32xbf16, #tpu.memory_space<vmem>>, vector<8x8xbf16>
    %c0_36 = arith.constant 0 : index
    %c8_37 = arith.constant 8 : index
    %72 = vector.load %arg12[%c0_36, %c8_37] : memref<8x32xbf16, #tpu.memory_space<vmem>>, vector<8x8xbf16>
    %cst_38 = arith.constant dense<0.000000e+00> : vector<8x8xf32>
    %73 = tpu.matmul %70, %71, %cst_38 {dimension_numbers = #tpu.dot_dimension_numbers<[1], [1], [0], [0], [0, 0, 1, 0], [], []>} : vector<8x8xbf16>, vector<8x8xbf16>, vector<8x8xf32> -> vector<8x8xf32>
    %cst_39 = arith.constant -1.000000e+30 : f32
    %74 = vector.broadcast %cst_39 : f32 to vector<8x8xf32>
    %75 = arith.select %50, %73, %74 : vector<8x8xi1>, vector<8x8xf32>
    %cst_40 = arith.constant dense<0xFF800000> : vector<8xf32>
    %76 = vector.multi_reduction <maximumf>, %75, %cst_40 [1] : vector<8x8xf32> to vector<8xf32>
    %77 = vector.shape_cast %76 : vector<8xf32> to vector<8x1xf32>
    %78 = vector.broadcast %77 : vector<8x1xf32> to vector<8x8xf32>
    %79 = arith.subf %75, %78 : vector<8x8xf32>
    %80 = math.exp %79 : vector<8x8xf32>
    %cst_41 = arith.constant dense<0.000000e+00> : vector<8xf32>
    %81 = vector.multi_reduction <add>, %80, %cst_41 [1] : vector<8x8xf32> to vector<8xf32>
    %82 = vector.shape_cast %81 : vector<8xf32> to vector<8x1xf32>
    %83 = arith.truncf %80 : vector<8x8xf32> to vector<8x8xbf16>
    %cst_42 = arith.constant dense<0.000000e+00> : vector<8x8xf32>
    %84 = tpu.matmul %83, %72, %cst_42 {dimension_numbers = #tpu.dot_dimension_numbers<[1], [0], [0], [1], [0, 0, 1, 1], [], []>} : vector<8x8xbf16>, vector<8x8xbf16>, vector<8x8xf32> -> vector<8x8xf32>
    %85 = vector.broadcast %82 : vector<8x1xf32> to vector<8x8xf32>
    %86 = arith.divf %84, %85 : vector<8x8xf32>
    %87 = arith.truncf %86 : vector<8x8xf32> to vector<8x8xbf16>
    %c0_43 = arith.constant 0 : index
    %c8_44 = arith.constant 8 : index
    %88 = vector.load %arg14[%c0_43, %c8_44] : memref<8x32xbf16, #tpu.memory_space<vmem>>, vector<8x8xbf16>
    tpu.vector_store %arg14[%c0_43, %c8_44], %87 {strides = array<i32>} : memref<8x32xbf16, #tpu.memory_space<vmem>>, vector<8x8xbf16>,
    %c0_45 = arith.constant 0 : index
    %c16 = arith.constant 16 : index
    %89 = vector.load %arg13[%c0_45, %c16] : memref<8x32xbf16, #tpu.memory_space<vmem>>, vector<8x8xbf16>
    %c0_46 = arith.constant 0 : index
    %c16_47 = arith.constant 16 : index
    %90 = vector.load %arg11[%c0_46, %c16_47] : memref<8x32xbf16, #tpu.memory_space<vmem>>, vector<8x8xbf16>
    %c0_48 = arith.constant 0 : index
    %c16_49 = arith.constant 16 : index
    %91 = vector.load %arg12[%c0_48, %c16_49] : memref<8x32xbf16, #tpu.memory_space<vmem>>, vector<8x8xbf16>
    %cst_50 = arith.constant dense<0.000000e+00> : vector<8x8xf32>
    %92 = tpu.matmul %89, %90, %cst_50 {dimension_numbers = #tpu.dot_dimension_numbers<[1], [1], [0], [0], [0, 0, 1, 0], [], []>} : vector<8x8xbf16>, vector<8x8xbf16>, vector<8x8xf32> -> vector<8x8xf32>
    %cst_51 = arith.constant -1.000000e+30 : f32
    %93 = vector.broadcast %cst_51 : f32 to vector<8x8xf32>
    %94 = arith.select %50, %92, %93 : vector<8x8xi1>, vector<8x8xf32>
    %cst_52 = arith.constant dense<0xFF800000> : vector<8xf32>
    %95 = vector.multi_reduction <maximumf>, %94, %cst_52 [1] : vector<8x8xf32> to vector<8xf32>
    %96 = vector.shape_cast %95 : vector<8xf32> to vector<8x1xf32>
    %97 = vector.broadcast %96 : vector<8x1xf32> to vector<8x8xf32>
    %98 = arith.subf %94, %97 : vector<8x8xf32>
    %99 = math.exp %98 : vector<8x8xf32>
    %cst_53 = arith.constant dense<0.000000e+00> : vector<8xf32>
    %100 = vector.multi_reduction <add>, %99, %cst_53 [1] : vector<8x8xf32> to vector<8xf32>
    %101 = vector.shape_cast %100 : vector<8xf32> to vector<8x1xf32>
    %102 = arith.truncf %99 : vector<8x8xf32> to vector<8x8xbf16>
    %cst_54 = arith.constant dense<0.000000e+00> : vector<8x8xf32>
    %103 = tpu.matmul %102, %91, %cst_54 {dimension_numbers = #tpu.dot_dimension_numbers<[1], [0], [0], [1], [0, 0, 1, 1], [], []>} : vector<8x8xbf16>, vector<8x8xbf16>, vector<8x8xf32> -> vector<8x8xf32>
    %104 = vector.broadcast %101 : vector<8x1xf32> to vector<8x8xf32>
    %105 = arith.divf %103, %104 : vector<8x8xf32>
    %106 = arith.truncf %105 : vector<8x8xf32> to vector<8x8xbf16>
    %c0_55 = arith.constant 0 : index
    %c16_56 = arith.constant 16 : index
    %107 = vector.load %arg14[%c0_55, %c16_56] : memref<8x32xbf16, #tpu.memory_space<vmem>>, vector<8x8xbf16>
    tpu.vector_store %arg14[%c0_55, %c16_56], %106 {strides = array<i32>} : memref<8x32xbf16, #tpu.memory_space<vmem>>, vector<8x8xbf16>,
    %c0_57 = arith.constant 0 : index
    %c24 = arith.constant 24 : index
    %108 = vector.load %arg13[%c0_57, %c24] : memref<8x32xbf16, #tpu.memory_space<vmem>>, vector<8x8xbf16>
    %c0_58 = arith.constant 0 : index
    %c24_59 = arith.constant 24 : index
    %109 = vector.load %arg11[%c0_58, %c24_59] : memref<8x32xbf16, #tpu.memory_space<vmem>>, vector<8x8xbf16>
    %c0_60 = arith.constant 0 : index
    %c24_61 = arith.constant 24 : index
    %110 = vector.load %arg12[%c0_60, %c24_61] : memref<8x32xbf16, #tpu.memory_space<vmem>>, vector<8x8xbf16>
    %cst_62 = arith.constant dense<0.000000e+00> : vector<8x8xf32>
    %111 = tpu.matmul %108, %109, %cst_62 {dimension_numbers = #tpu.dot_dimension_numbers<[1], [1], [0], [0], [0, 0, 1, 0], [], []>} : vector<8x8xbf16>, vector<8x8xbf16>, vector<8x8xf32> -> vector<8x8xf32>
    %cst_63 = arith.constant -1.000000e+30 : f32
    %112 = vector.broadcast %cst_63 : f32 to vector<8x8xf32>
    %113 = arith.select %50, %111, %112 : vector<8x8xi1>, vector<8x8xf32>
    %cst_64 = arith.constant dense<0xFF800000> : vector<8xf32>
    %114 = vector.multi_reduction <maximumf>, %113, %cst_64 [1] : vector<8x8xf32> to vector<8xf32>
    %115 = vector.shape_cast %114 : vector<8xf32> to vector<8x1xf32>
    %116 = vector.broadcast %115 : vector<8x1xf32> to vector<8x8xf32>
    %117 = arith.subf %113, %116 : vector<8x8xf32>
    %118 = math.exp %117 : vector<8x8xf32>
    %cst_65 = arith.constant dense<0.000000e+00> : vector<8xf32>
    %119 = vector.multi_reduction <add>, %118, %cst_65 [1] : vector<8x8xf32> to vector<8xf32>
    %120 = vector.shape_cast %119 : vector<8xf32> to vector<8x1xf32>
    %121 = arith.truncf %118 : vector<8x8xf32> to vector<8x8xbf16>
    %cst_66 = arith.constant dense<0.000000e+00> : vector<8x8xf32>
    %122 = tpu.matmul %121, %110, %cst_66 {dimension_numbers = #tpu.dot_dimension_numbers<[1], [0], [0], [1], [0, 0, 1, 1], [], []>} : vector<8x8xbf16>, vector<8x8xbf16>, vector<8x8xf32> -> vector<8x8xf32>
    %123 = vector.broadcast %120 : vector<8x1xf32> to vector<8x8xf32>
    %124 = arith.divf %122, %123 : vector<8x8xf32>
    %125 = arith.truncf %124 : vector<8x8xf32> to vector<8x8xbf16>
    %c0_67 = arith.constant 0 : index
    %c24_68 = arith.constant 24 : index
    %126 = vector.load %arg14[%c0_67, %c24_68] : memref<8x32xbf16, #tpu.memory_space<vmem>>, vector<8x8xbf16>
    tpu.vector_store %arg14[%c0_67, %c24_68], %125 {strides = array<i32>} : memref<8x32xbf16, #tpu.memory_space<vmem>>, vector<8x8xbf16>,
    %c0_69 = arith.constant 0 : index
    %c0_70 = arith.constant 0 : index
    %127 = vector.load %arg14[%c0_69, %c0_70] : memref<8x32xbf16, #tpu.memory_space<vmem>>, vector<8x32xbf16>
    %c0_71 = arith.constant 0 : index
    %c0_72 = arith.constant 0 : index
    %128 = vector.load %arg7[%c0_71, %c0_72] : memref<32x32xbf16, #tpu.memory_space<vmem>>, vector<32x32xbf16>
    %cst_73 = arith.constant dense<0.000000e+00> : vector<8x32xf32>
    %129 = tpu.matmul %127, %128, %cst_73 {dimension_numbers = #tpu.dot_dimension_numbers<[1], [0], [0], [1], [0, 0, 1, 1], [], []>} : vector<8x32xbf16>, vector<32x32xbf16>, vector<8x32xf32> -> vector<8x32xf32>
    %130 = arith.addf %13, %129 : vector<8x32xf32>
    %131 = vector.broadcast %4 : vector<1x32xf32> to vector<8x32xf32>
    %132 = arith.addf %130, %131 : vector<8x32xf32>
    %c0_74 = arith.constant 0 : index
    %c0_75 = arith.constant 0 : index
    %133 = vector.load %arg15[%c0_74, %c0_75] : memref<8x32xf32, #tpu.memory_space<vmem>>, vector<8x32xf32>
    tpu.vector_store %arg15[%c0_74, %c0_75], %132 {strides = array<i32>} : memref<8x32xf32, #tpu.memory_space<vmem>>, vector<8x32xf32>,
    %c0_76 = arith.constant 0 : index
    %c0_77 = arith.constant 0 : index
    %134 = vector.load %arg15[%c0_76, %c0_77] : memref<8x32xf32, #tpu.memory_space<vmem>>, vector<8x32xf32>
    %cst_78 = arith.constant dense<0.000000e+00> : vector<8xf32>
    %135 = vector.multi_reduction <add>, %134, %cst_78 [1] : vector<8x32xf32> to vector<8xf32>
    %136 = vector.shape_cast %135 : vector<8xf32> to vector<8x1xf32>
    %cst_79 = arith.constant 3.200000e+01 : f32
    %137 = vector.broadcast %cst_79 : f32 to vector<8x1xf32>
    %138 = arith.divf %136, %137 : vector<8x1xf32>
    %139 = vector.broadcast %138 : vector<8x1xf32> to vector<8x32xf32>
    %140 = arith.subf %134, %139 : vector<8x32xf32>
    %141 = arith.mulf %140, %140 : vector<8x32xf32>
    %cst_80 = arith.constant dense<0.000000e+00> : vector<8xf32>
    %142 = vector.multi_reduction <add>, %141, %cst_80 [1] : vector<8x32xf32> to vector<8xf32>
    %143 = vector.shape_cast %142 : vector<8xf32> to vector<8x1xf32>
    %cst_81 = arith.constant 3.200000e+01 : f32
    %144 = vector.broadcast %cst_81 : f32 to vector<8x1xf32>
    %145 = arith.divf %143, %144 : vector<8x1xf32>
    %146 = vector.broadcast %138 : vector<8x1xf32> to vector<8x32xf32>
    %147 = arith.subf %134, %146 : vector<8x32xf32>
    %cst_82 = arith.constant 9.99999974E-6 : f32
    %148 = vector.broadcast %cst_82 : f32 to vector<8x1xf32>
    %149 = arith.addf %145, %148 : vector<8x1xf32>
    %150 = math.rsqrt %149 : vector<8x1xf32>
    %151 = vector.broadcast %150 : vector<8x1xf32> to vector<8x32xf32>
    %152 = arith.mulf %147, %151 : vector<8x32xf32>
    %153 = vector.broadcast %2 : vector<1x32xf32> to vector<8x32xf32>
    %154 = arith.mulf %152, %153 : vector<8x32xf32>
    %155 = vector.broadcast %3 : vector<1x32xf32> to vector<8x32xf32>
    %156 = arith.addf %154, %155 : vector<8x32xf32>
    %157 = arith.truncf %156 : vector<8x32xf32> to vector<8x32xbf16>
    %c0_83 = arith.constant 0 : index
    %c0_84 = arith.constant 0 : index
    %158 = vector.load %arg14[%c0_83, %c0_84] : memref<8x32xbf16, #tpu.memory_space<vmem>>, vector<8x32xbf16>
    tpu.vector_store %arg14[%c0_83, %c0_84], %157 {strides = array<i32>} : memref<8x32xbf16, #tpu.memory_space<vmem>>, vector<8x32xbf16>,
    %c0_85 = arith.constant 0 : index
    %c0_86 = arith.constant 0 : index
    %159 = vector.load %arg14[%c0_85, %c0_86] : memref<8x32xbf16, #tpu.memory_space<vmem>>, vector<8x32xbf16>
    %c0_87 = arith.constant 0 : index
    %c0_88 = arith.constant 0 : index
    %160 = vector.load %arg8[%c0_87, %c0_88] : memref<32x128xbf16, #tpu.memory_space<vmem>>, vector<32x128xbf16>
    %cst_89 = arith.constant dense<0.000000e+00> : vector<8x128xf32>
    %161 = tpu.matmul %159, %160, %cst_89 {dimension_numbers = #tpu.dot_dimension_numbers<[1], [0], [0], [1], [0, 0, 1, 1], [], []>} : vector<8x32xbf16>, vector<32x128xbf16>, vector<8x128xf32> -> vector<8x128xf32>
    %c0_90 = arith.constant 0 : index
    %c0_91 = arith.constant 0 : index
    %162 = vector.load %arg5[%c0_90, %c0_91] : memref<1x128xf32, #tpu.memory_space<vmem>>, vector<1x128xf32>
    %163 = vector.broadcast %162 : vector<1x128xf32> to vector<8x128xf32>
    %164 = arith.addf %161, %163 : vector<8x128xf32>
    %cst_92 = arith.constant 5.000000e-01 : f32
    %165 = vector.broadcast %cst_92 : f32 to vector<8x128xf32>
    %166 = arith.mulf %165, %164 : vector<8x128xf32>
    %cst_93 = arith.constant 4.471500e-02 : f32
    %167 = vector.broadcast %cst_93 : f32 to vector<8x128xf32>
    %168 = arith.mulf %167, %164 : vector<8x128xf32>
    %169 = arith.mulf %168, %164 : vector<8x128xf32>
    %170 = arith.mulf %169, %164 : vector<8x128xf32>
    %171 = arith.addf %164, %170 : vector<8x128xf32>
    %cst_94 = arith.constant 0.797884583 : f32
    %172 = vector.broadcast %cst_94 : f32 to vector<8x128xf32>
    %173 = arith.mulf %172, %171 : vector<8x128xf32>
    %174 = math.tanh %173 : vector<8x128xf32>
    %cst_95 = arith.constant 1.000000e+00 : f32
    %175 = vector.broadcast %cst_95 : f32 to vector<8x128xf32>
    %176 = arith.addf %175, %174 : vector<8x128xf32>
    %177 = arith.mulf %166, %176 : vector<8x128xf32>
    %178 = arith.truncf %177 : vector<8x128xf32> to vector<8x128xbf16>
    %c0_96 = arith.constant 0 : index
    %c0_97 = arith.constant 0 : index
    %179 = vector.load %arg16[%c0_96, %c0_97] : memref<8x128xbf16, #tpu.memory_space<vmem>>, vector<8x128xbf16>
    tpu.vector_store %arg16[%c0_96, %c0_97], %178 {strides = array<i32>} : memref<8x128xbf16, #tpu.memory_space<vmem>>, vector<8x128xbf16>,
    %c0_98 = arith.constant 0 : index
    %c0_99 = arith.constant 0 : index
    %180 = vector.load %arg16[%c0_98, %c0_99] : memref<8x128xbf16, #tpu.memory_space<vmem>>, vector<8x128xbf16>
    %c0_100 = arith.constant 0 : index
    %c0_101 = arith.constant 0 : index
    %181 = vector.load %arg9[%c0_100, %c0_101] : memref<128x32xbf16, #tpu.memory_space<vmem>>, vector<128x32xbf16>
    %cst_102 = arith.constant dense<0.000000e+00> : vector<8x32xf32>
    %182 = tpu.matmul %180, %181, %cst_102 {dimension_numbers = #tpu.dot_dimension_numbers<[1], [0], [0], [1], [0, 0, 1, 1], [], []>} : vector<8x128xbf16>, vector<128x32xbf16>, vector<8x32xf32> -> vector<8x32xf32>
    %c0_103 = arith.constant 0 : index
    %c0_104 = arith.constant 0 : index
    %183 = vector.load %arg15[%c0_103, %c0_104] : memref<8x32xf32, #tpu.memory_space<vmem>>, vector<8x32xf32>
    %184 = arith.addf %183, %182 : vector<8x32xf32>
    %185 = vector.broadcast %5 : vector<1x32xf32> to vector<8x32xf32>
    %186 = arith.addf %184, %185 : vector<8x32xf32>
    %c0_105 = arith.constant 0 : index
    %c0_106 = arith.constant 0 : index
    %c0_107 = arith.constant 0 : index
    %187 = vector.load %arg10[%c0_105, %c0_106, %c0_107] : memref<1x8x32xf32, #tpu.memory_space<vmem>>, vector<1x8x32xf32>
    %188 = vector.shape_cast %187 : vector<1x8x32xf32> to vector<8x32xf32>
    %189 = vector.shape_cast %186 : vector<8x32xf32> to vector<1x8x32xf32>
    tpu.vector_store %arg10[%c0_105, %c0_106, %c0_107], %189 {strides = array<i32>} : memref<1x8x32xf32, #tpu.memory_space<vmem>>, vector<1x8x32xf32>,
    return
  }
  func.func @transform_0(%arg0: i32, %arg1: i32) -> (i32, i32, i32) {
    %c0_i32 = arith.constant 0 : i32
    %c0_i32_0 = arith.constant 0 : i32
    %c0_i32_1 = arith.constant 0 : i32
    return %arg0, %c0_i32, %c0_i32_0 : i32, i32, i32
  }
  func.func @transform_1(%arg0: i32, %arg1: i32) -> (i32, i32) {
    %c0_i32 = arith.constant 0 : i32
    %c0_i32_0 = arith.constant 0 : i32
    %c0_i32_1 = arith.constant 0 : i32
    return %c0_i32, %c0_i32_0 : i32, i32
  }
  func.func @transform_2(%arg0: i32, %arg1: i32) -> (i32, i32) {
    %c0_i32 = arith.constant 0 : i32
    %c0_i32_0 = arith.constant 0 : i32
    %c0_i32_1 = arith.constant 0 : i32
    return %c0_i32, %c0_i32_0 : i32, i32
  }
  func.func @transform_3(%arg0: i32, %arg1: i32) -> (i32, i32) {
    %c0_i32 = arith.constant 0 : i32
    %c0_i32_0 = arith.constant 0 : i32
    %c0_i32_1 = arith.constant 0 : i32
    return %c0_i32, %c0_i32_0 : i32, i32
  }
  func.func @transform_4(%arg0: i32, %arg1: i32) -> (i32, i32) {
    %c0_i32 = arith.constant 0 : i32
    %c0_i32_0 = arith.constant 0 : i32
    %c0_i32_1 = arith.constant 0 : i32
    return %c0_i32, %c0_i32_0 : i32, i32
  }
  func.func @transform_5(%arg0: i32, %arg1: i32) -> (i32, i32) {
    %c0_i32 = arith.constant 0 : i32
    %c0_i32_0 = arith.constant 0 : i32
    %c0_i32_1 = arith.constant 0 : i32
    return %c0_i32, %c0_i32_0 : i32, i32
  }
  func.func @transform_6(%arg0: i32, %arg1: i32) -> (i32, i32) {
    %c0_i32 = arith.constant 0 : i32
    %c0_i32_0 = arith.constant 0 : i32
    %c0_i32_1 = arith.constant 0 : i32
    return %c0_i32, %c0_i32_0 : i32, i32
  }
  func.func @transform_7(%arg0: i32, %arg1: i32) -> (i32, i32) {
    %c0_i32 = arith.constant 0 : i32
    %c0_i32_0 = arith.constant 0 : i32
    %c0_i32_1 = arith.constant 0 : i32
    return %c0_i32, %c0_i32_0 : i32, i32
  }
  func.func @transform_8(%arg0: i32, %arg1: i32) -> (i32, i32, i32) {
    %c0_i32 = arith.constant 0 : i32
    %c0_i32_0 = arith.constant 0 : i32
    return %arg0, %arg1, %c0_i32 : i32, i32, i32
  }
}

module attributes {stable_mosaic.version = 11 : i64} {
  func.func @block_kernel(%arg0: i32, %arg1: i32, %arg2: memref<1x8x32xf32, #tpu.memory_space<vmem>>, %arg3: memref<6x32xf32, #tpu.memory_space<vmem>>, %arg4: memref<1x96xf32, #tpu.memory_space<vmem>>, %arg5: memref<1x128xf32, #tpu.memory_space<vmem>>, %arg6: memref<32x96xbf16, #tpu.memory_space<vmem>>, %arg7: memref<32x32xbf16, #tpu.memory_space<vmem>>, %arg8: memref<32x128xbf16, #tpu.memory_space<vmem>>, %arg9: memref<128x32xbf16, #tpu.memory_space<vmem>>, %arg10: memref<1x8x32xf32, #tpu.memory_space<vmem>>, %arg11: memref<8x32xbf16, #tpu.memory_space<vmem>>, %arg12: memref<8x32xbf16, #tpu.memory_space<vmem>>, %arg13: memref<8x32xbf16, #tpu.memory_space<vmem>>, %arg14: memref<8x32xbf16, #tpu.memory_space<vmem>>, %arg15: memref<8x32xf32, #tpu.memory_space<vmem>>, %arg16: memref<8x128xbf16, #tpu.memory_space<vmem>>) attributes {dimension_semantics = [#tpu.dimension_semantics<parallel>, #tpu.dimension_semantics<arbitrary>], iteration_bounds = array<i64: 2, 1>, scalar_prefetch = 0 : i64, scratch_operands = 6 : i64, tpu.core_type = #tpu.core_type<tc>, window_params = [{transform_indices = @transform_0, window_bounds = array<i64: 1, 8, 32>}, {pipeline_mode = #tpu.pipeline_mode<synchronous>, transform_indices = @transform_1, window_bounds = array<i64: 6, 32>}, {pipeline_mode = #tpu.pipeline_mode<synchronous>, transform_indices = @transform_2, window_bounds = array<i64: 1, 96>}, {pipeline_mode = #tpu.pipeline_mode<synchronous>, transform_indices = @transform_3, window_bounds = array<i64: 1, 128>}, {pipeline_mode = #tpu.pipeline_mode<synchronous>, transform_indices = @transform_4, window_bounds = array<i64: 32, 96>}, {pipeline_mode = #tpu.pipeline_mode<synchronous>, transform_indices = @transform_5, window_bounds = array<i64: 32, 32>}, {pipeline_mode = #tpu.pipeline_mode<synchronous>, transform_indices = @transform_6, window_bounds = array<i64: 32, 128>}, {pipeline_mode = #tpu.pipeline_mode<synchronous>, transform_indices = @transform_7, window_bounds = array<i64: 128, 32>}, {transform_indices = @transform_8, window_bounds = array<i64: 1, 8, 32>}]} {
    %c0 = arith.constant 0 : index
    %c0_0 = arith.constant 0 : index
    %0 = vector.load %arg3[%c0, %c0_0] : memref<6x32xf32, #tpu.memory_space<vmem>>, vector<1x32xf32>
    %c1 = arith.constant 1 : index
    %c0_1 = arith.constant 0 : index
    %1 = vector.load %arg3[%c1, %c0_1] : memref<6x32xf32, #tpu.memory_space<vmem>>, vector<1x32xf32>
    %c2 = arith.constant 2 : index
    %c0_2 = arith.constant 0 : index
    %2 = vector.load %arg3[%c2, %c0_2] : memref<6x32xf32, #tpu.memory_space<vmem>>, vector<1x32xf32>
    %c3 = arith.constant 3 : index
    %c0_3 = arith.constant 0 : index
    %3 = vector.load %arg3[%c3, %c0_3] : memref<6x32xf32, #tpu.memory_space<vmem>>, vector<1x32xf32>
    %c4 = arith.constant 4 : index
    %c0_4 = arith.constant 0 : index
    %4 = vector.load %arg3[%c4, %c0_4] : memref<6x32xf32, #tpu.memory_space<vmem>>, vector<1x32xf32>
    %c5 = arith.constant 5 : index
    %c0_5 = arith.constant 0 : index
    %5 = vector.load %arg3[%c5, %c0_5] : memref<6x32xf32, #tpu.memory_space<vmem>>, vector<1x32xf32>
    %c0_i32 = arith.constant 0 : i32
    %6 = arith.cmpi eq, %arg1, %c0_i32 : i32
    %7 = arith.extui %6 : i1 to i32
    %c0_i32_6 = arith.constant 0 : i32
    %8 = arith.cmpi ne, %7, %c0_i32_6 : i32
    scf.if %8 {
      %c0_108 = arith.constant 0 : index
      %c0_109 = arith.constant 0 : index
      %c0_110 = arith.constant 0 : index
      %190 = vector.load %arg2[%c0_108, %c0_109, %c0_110] : memref<1x8x32xf32, #tpu.memory_space<vmem>>, vector<1x8x32xf32>
      %191 = vector.shape_cast %190 : vector<1x8x32xf32> to vector<8x32xf32>
      %cst_111 = arith.constant dense<0.000000e+00> : vector<8xf32>
      %192 = vector.multi_reduction <add>, %191, %cst_111 [1] : vector<8x32xf32> to vector<8xf32>
      %193 = vector.shape_cast %192 : vector<8xf32> to vector<8x1xf32>
      %cst_112 = arith.constant 3.200000e+01 : f32
      %194 = vector.broadcast %cst_112 : f32 to vector<8x1xf32>
      %195 = arith.divf %193, %194 : vector<8x1xf32>
      %196 = vector.broadcast %195 : vector<8x1xf32> to vector<8x32xf32>
      %197 = arith.subf %191, %196 : vector<8x32xf32>
      %198 = arith.mulf %197, %197 : vector<8x32xf32>
      %cst_113 = arith.constant dense<0.000000e+00> : vector<8xf32>
      %199 = vector.multi_reduction <add>, %198, %cst_113 [1] : vector<8x32xf32> to vector<8xf32>
      %200 = vector.shape_cast %199 : vector<8xf32> to vector<8x1xf32>
      %cst_114 = arith.constant 3.200000e+01 : f32
      %201 = vector.broadcast %cst_114 : f32 to vector<8x1xf32>
      %202 = arith.divf %200, %201 : vector<8x1xf32>
      %203 = vector.broadcast %195 : vector<8x1xf32> to vector<8x32xf32>
      %204 = arith.subf %191, %203 : vector<8x32xf32>
      %cst_115 = arith.constant 9.99999974E-6 : f32
      %205 = vector.broadcast %cst_115 : f32 to vector<8x1xf32>
      %206 = arith.addf %202, %205 : vector<8x1xf32>
      %207 = math.rsqrt %206 : vector<8x1xf32>
      %208 = vector.broadcast %207 : vector<8x1xf32> to vector<8x32xf32>
      %209 = arith.mulf %204, %208 : vector<8x32xf32>
      %210 = vector.broadcast %0 : vector<1x32xf32> to vector<8x32xf32>
      %211 = arith.mulf %209, %210 : vector<8x32xf32>
      %212 = vector.broadcast %1 : vector<1x32xf32> to vector<8x32xf32>
      %213 = arith.addf %211, %212 : vector<8x32xf32>
      %214 = arith.truncf %213 : vector<8x32xf32> to vector<8x32xbf16>
      %c0_116 = arith.constant 0 : index
      %c32 = arith.constant 32 : index
      %215 = vector.load %arg6[%c0_116, %c32] : memref<32x96xbf16, #tpu.memory_space<vmem>>, vector<32x32xbf16>
      %cst_117 = arith.constant dense<0.000000e+00> : vector<8x32xf32>
      %216 = tpu.matmul %214, %215, %cst_117 {dimension_numbers = #tpu.dot_dimension_numbers<[1], [0], [0], [1], [0, 0, 1, 1], [], []>} : vector<8x32xbf16>, vector<32x32xbf16>, vector<8x32xf32> -> vector<8x32xf32>
      %c0_118 = arith.constant 0 : index
      %c32_119 = arith.constant 32 : index
      %217 = vector.load %arg4[%c0_118, %c32_119] : memref<1x96xf32, #tpu.memory_space<vmem>>, vector<1x32xf32>
      %218 = vector.broadcast %217 : vector<1x32xf32> to vector<8x32xf32>
      %219 = arith.addf %216, %218 : vector<8x32xf32>
      %220 = arith.truncf %219 : vector<8x32xf32> to vector<8x32xbf16>
      %c0_120 = arith.constant 0 : index
      %c0_121 = arith.constant 0 : index
      %221 = vector.load %arg11[%c0_120, %c0_121] : memref<8x32xbf16, #tpu.memory_space<vmem>>, vector<8x32xbf16>
      tpu.vector_store %arg11[%c0_120, %c0_121], %220 {strides = array<i32>} : memref<8x32xbf16, #tpu.memory_space<vmem>>, vector<8x32xbf16>,
      %c0_122 = arith.constant 0 : index
      %c64 = arith.constant 64 : index
      %222 = vector.load %arg6[%c0_122, %c64] : memref<32x96xbf16, #tpu.memory_space<vmem>>, vector<32x32xbf16>
      %cst_123 = arith.constant dense<0.000000e+00> : vector<8x32xf32>
      %223 = tpu.matmul %214, %222, %cst_123 {dimension_numbers = #tpu.dot_dimension_numbers<[1], [0], [0], [1], [0, 0, 1, 1], [], []>} : vector<8x32xbf16>, vector<32x32xbf16>, vector<8x32xf32> -> vector<8x32xf32>
      %c0_124 = arith.constant 0 : index
      %c64_125 = arith.constant 64 : index
      %224 = vector.load %arg4[%c0_124, %c64_125] : memref<1x96xf32, #tpu.memory_space<vmem>>, vector<1x32xf32>
      %225 = vector.broadcast %224 : vector<1x32xf32> to vector<8x32xf32>
      %226 = arith.addf %223, %225 : vector<8x32xf32>
      %227 = arith.truncf %226 : vector<8x32xf32> to vector<8x32xbf16>
      %c0_126 = arith.constant 0 : index
      %c0_127 = arith.constant 0 : index
      %228 = vector.load %arg12[%c0_126, %c0_127] : memref<8x32xbf16, #tpu.memory_space<vmem>>, vector<8x32xbf16>
      tpu.vector_store %arg12[%c0_126, %c0_127], %227 {strides = array<i32>} : memref<8x32xbf16, #tpu.memory_space<vmem>>, vector<8x32xbf16>,
    } else {
    }
    %c8_i32 = arith.constant 8 : i32
    %9 = arith.muli %arg1, %c8_i32 : i32
    %10 = tpu.assume_multiple %9, 8 : i32
    %c0_7 = arith.constant 0 : index
    %11 = arith.index_cast %10 : i32 to index
    %c0_8 = arith.constant 0 : index
    %12 = vector.load %arg2[%c0_7, %11, %c0_8] : memref<1x8x32xf32, #tpu.memory_space<vmem>>, vector<1x8x32xf32>
    %13 = vector.shape_cast %12 : vector<1x8x32xf32> to vector<8x32xf32>
    %cst = arith.constant dense<0.000000e+00> : vector<8xf32>
    %14 = vector.multi_reduction <add>, %13, %cst [1] : vector<8x32xf32> to vector<8xf32>
    %15 = vector.shape_cast %14 : vector<8xf32> to vector<8x1xf32>
    %cst_9 = arith.constant 3.200000e+01 : f32
    %16 = vector.broadcast %cst_9 : f32 to vector<8x1xf32>
    %17 = arith.divf %15, %16 : vector<8x1xf32>
    %18 = vector.broadcast %17 : vector<8x1xf32> to vector<8x32xf32>
    %19 = arith.subf %13, %18 : vector<8x32xf32>
    %20 = arith.mulf %19, %19 : vector<8x32xf32>
    %cst_10 = arith.constant dense<0.000000e+00> : vector<8xf32>
    %21 = vector.multi_reduction <add>, %20, %cst_10 [1] : vector<8x32xf32> to vector<8xf32>
    %22 = vector.shape_cast %21 : vector<8xf32> to vector<8x1xf32>
    %cst_11 = arith.constant 3.200000e+01 : f32
    %23 = vector.broadcast %cst_11 : f32 to vector<8x1xf32>
    %24 = arith.divf %22, %23 : vector<8x1xf32>
    %25 = vector.broadcast %17 : vector<8x1xf32> to vector<8x32xf32>
    %26 = arith.subf %13, %25 : vector<8x32xf32>
    %cst_12 = arith.constant 9.99999974E-6 : f32
    %27 = vector.broadcast %cst_12 : f32 to vector<8x1xf32>
    %28 = arith.addf %24, %27 : vector<8x1xf32>
    %29 = math.rsqrt %28 : vector<8x1xf32>
    %30 = vector.broadcast %29 : vector<8x1xf32> to vector<8x32xf32>
    %31 = arith.mulf %26, %30 : vector<8x32xf32>
    %32 = vector.broadcast %0 : vector<1x32xf32> to vector<8x32xf32>
    %33 = arith.mulf %31, %32 : vector<8x32xf32>
    %34 = vector.broadcast %1 : vector<1x32xf32> to vector<8x32xf32>
    %35 = arith.addf %33, %34 : vector<8x32xf32>
    %36 = arith.truncf %35 : vector<8x32xf32> to vector<8x32xbf16>
    %c0_13 = arith.constant 0 : index
    %c0_14 = arith.constant 0 : index
    %37 = vector.load %arg6[%c0_13, %c0_14] : memref<32x96xbf16, #tpu.memory_space<vmem>>, vector<32x32xbf16>
    %cst_15 = arith.constant dense<0.000000e+00> : vector<8x32xf32>
    %38 = tpu.matmul %36, %37, %cst_15 {dimension_numbers = #tpu.dot_dimension_numbers<[1], [0], [0], [1], [0, 0, 1, 1], [], []>} : vector<8x32xbf16>, vector<32x32xbf16>, vector<8x32xf32> -> vector<8x32xf32>
    %c0_16 = arith.constant 0 : index
    %c0_17 = arith.constant 0 : index
    %39 = vector.load %arg4[%c0_16, %c0_17] : memref<1x96xf32, #tpu.memory_space<vmem>>, vector<1x32xf32>
    %40 = vector.broadcast %39 : vector<1x32xf32> to vector<8x32xf32>
    %41 = arith.addf %38, %40 : vector<8x32xf32>
    %42 = arith.truncf %41 : vector<8x32xf32> to vector<8x32xbf16>
    %c0_18 = arith.constant 0 : index
    %c0_19 = arith.constant 0 : index
    %43 = vector.load %arg13[%c0_18, %c0_19] : memref<8x32xbf16, #tpu.memory_space<vmem>>, vector<8x32xbf16>
    tpu.vector_store %arg13[%c0_18, %c0_19], %42 {strides = array<i32>} : memref<8x32xbf16, #tpu.memory_space<vmem>>, vector<8x32xbf16>,
    %44 = tpu.iota {dimensions = array<i32: 0>} : vector<8x1xi32>
    %45 = vector.broadcast %10 : i32 to vector<8x1xi32>
    %46 = arith.addi %45, %44 : vector<8x1xi32>
    %47 = tpu.iota {dimensions = array<i32: 1>} : vector<1x8xi32>
    %48 = vector.broadcast %47 : vector<1x8xi32> to vector<8x8xi32>
    %49 = vector.broadcast %46 : vector<8x1xi32> to vector<8x8xi32>
    %50 = arith.cmpi sle, %48, %49 : vector<8x8xi32>
    %c0_20 = arith.constant 0 : index
    %c0_21 = arith.constant 0 : index
    %51 = vector.load %arg13[%c0_20, %c0_21] : memref<8x32xbf16, #tpu.memory_space<vmem>>, vector<8x8xbf16>
    %c0_22 = arith.constant 0 : index
    %c0_23 = arith.constant 0 : index
    %52 = vector.load %arg11[%c0_22, %c0_23] : memref<8x32xbf16, #tpu.memory_space<vmem>>, vector<8x8xbf16>
    %c0_24 = arith.constant 0 : index
    %c0_25 = arith.constant 0 : index
    %53 = vector.load %arg12[%c0_24, %c0_25] : memref<8x32xbf16, #tpu.memory_space<vmem>>, vector<8x8xbf16>
    %cst_26 = arith.constant dense<0.000000e+00> : vector<8x8xf32>
    %54 = tpu.matmul %51, %52, %cst_26 {dimension_numbers = #tpu.dot_dimension_numbers<[1], [1], [0], [0], [0, 0, 1, 0], [], []>} : vector<8x8xbf16>, vector<8x8xbf16>, vector<8x8xf32> -> vector<8x8xf32>
    %cst_27 = arith.constant -1.000000e+30 : f32
    %55 = vector.broadcast %cst_27 : f32 to vector<8x8xf32>
    %56 = arith.select %50, %54, %55 : vector<8x8xi1>, vector<8x8xf32>
    %cst_28 = arith.constant dense<0xFF800000> : vector<8xf32>
    %57 = vector.multi_reduction <maximumf>, %56, %cst_28 [1] : vector<8x8xf32> to vector<8xf32>
    %58 = vector.shape_cast %57 : vector<8xf32> to vector<8x1xf32>
    %59 = vector.broadcast %58 : vector<8x1xf32> to vector<8x8xf32>
    %60 = arith.subf %56, %59 : vector<8x8xf32>
    %61 = math.exp %60 : vector<8x8xf32>
    %cst_29 = arith.constant dense<0.000000e+00> : vector<8xf32>
    %62 = vector.multi_reduction <add>, %61, %cst_29 [1] : vector<8x8xf32> to vector<8xf32>
    %63 = vector.shape_cast %62 : vector<8xf32> to vector<8x1xf32>
    %64 = arith.truncf %61 : vector<8x8xf32> to vector<8x8xbf16>
    %cst_30 = arith.constant dense<0.000000e+00> : vector<8x8xf32>
    %65 = tpu.matmul %64, %53, %cst_30 {dimension_numbers = #tpu.dot_dimension_numbers<[1], [0], [0], [1], [0, 0, 1, 1], [], []>} : vector<8x8xbf16>, vector<8x8xbf16>, vector<8x8xf32> -> vector<8x8xf32>
    %66 = vector.broadcast %63 : vector<8x1xf32> to vector<8x8xf32>
    %67 = arith.divf %65, %66 : vector<8x8xf32>
    %68 = arith.truncf %67 : vector<8x8xf32> to vector<8x8xbf16>
    %c0_31 = arith.constant 0 : index
    %c0_32 = arith.constant 0 : index
    %69 = vector.load %arg14[%c0_31, %c0_32] : memref<8x32xbf16, #tpu.memory_space<vmem>>, vector<8x8xbf16>
    tpu.vector_store %arg14[%c0_31, %c0_32], %68 {strides = array<i32>} : memref<8x32xbf16, #tpu.memory_space<vmem>>, vector<8x8xbf16>,
    %c0_33 = arith.constant 0 : index
    %c8 = arith.constant 8 : index
    %70 = vector.load %arg13[%c0_33, %c8] : memref<8x32xbf16, #tpu.memory_space<vmem>>, vector<8x8xbf16>
    %c0_34 = arith.constant 0 : index
    %c8_35 = arith.constant 8 : index
    %71 = vector.load %arg11[%c0_34, %c8_35] : memref<8x32xbf16, #tpu.memory_space<vmem>>, vector<8x8xbf16>
    %c0_36 = arith.constant 0 : index
    %c8_37 = arith.constant 8 : index
    %72 = vector.load %arg12[%c0_36, %c8_37] : memref<8x32xbf16, #tpu.memory_space<vmem>>, vector<8x8xbf16>
    %cst_38 = arith.constant dense<0.000000e+00> : vector<8x8xf32>
    %73 = tpu.matmul %70, %71, %cst_38 {dimension_numbers = #tpu.dot_dimension_numbers<[1], [1], [0], [0], [0, 0, 1, 0], [], []>} : vector<8x8xbf16>, vector<8x8xbf16>, vector<8x8xf32> -> vector<8x8xf32>
    %cst_39 = arith.constant -1.000000e+30 : f32
    %74 = vector.broadcast %cst_39 : f32 to vector<8x8xf32>
    %75 = arith.select %50, %73, %74 : vector<8x8xi1>, vector<8x8xf32>
    %cst_40 = arith.constant dense<0xFF800000> : vector<8xf32>
    %76 = vector.multi_reduction <maximumf>, %75, %cst_40 [1] : vector<8x8xf32> to vector<8xf32>
    %77 = vector.shape_cast %76 : vector<8xf32> to vector<8x1xf32>
    %78 = vector.broadcast %77 : vector<8x1xf32> to vector<8x8xf32>
    %79 = arith.subf %75, %78 : vector<8x8xf32>
    %80 = math.exp %79 : vector<8x8xf32>
    %cst_41 = arith.constant dense<0.000000e+00> : vector<8xf32>
    %81 = vector.multi_reduction <add>, %80, %cst_41 [1] : vector<8x8xf32> to vector<8xf32>
    %82 = vector.shape_cast %81 : vector<8xf32> to vector<8x1xf32>
    %83 = arith.truncf %80 : vector<8x8xf32> to vector<8x8xbf16>
    %cst_42 = arith.constant dense<0.000000e+00> : vector<8x8xf32>
    %84 = tpu.matmul %83, %72, %cst_42 {dimension_numbers = #tpu.dot_dimension_numbers<[1], [0], [0], [1], [0, 0, 1, 1], [], []>} : vector<8x8xbf16>, vector<8x8xbf16>, vector<8x8xf32> -> vector<8x8xf32>
    %85 = vector.broadcast %82 : vector<8x1xf32> to vector<8x8xf32>
    %86 = arith.divf %84, %85 : vector<8x8xf32>
    %87 = arith.truncf %86 : vector<8x8xf32> to vector<8x8xbf16>
    %c0_43 = arith.constant 0 : index
    %c8_44 = arith.constant 8 : index
    %88 = vector.load %arg14[%c0_43, %c8_44] : memref<8x32xbf16, #tpu.memory_space<vmem>>, vector<8x8xbf16>
    tpu.vector_store %arg14[%c0_43, %c8_44], %87 {strides = array<i32>} : memref<8x32xbf16, #tpu.memory_space<vmem>>, vector<8x8xbf16>,
    %c0_45 = arith.constant 0 : index
    %c16 = arith.constant 16 : index
    %89 = vector.load %arg13[%c0_45, %c16] : memref<8x32xbf16, #tpu.memory_space<vmem>>, vector<8x8xbf16>
    %c0_46 = arith.constant 0 : index
    %c16_47 = arith.constant 16 : index
    %90 = vector.load %arg11[%c0_46, %c16_47] : memref<8x32xbf16, #tpu.memory_space<vmem>>, vector<8x8xbf16>
    %c0_48 = arith.constant 0 : index
    %c16_49 = arith.constant 16 : index
    %91 = vector.load %arg12[%c0_48, %c16_49] : memref<8x32xbf16, #tpu.memory_space<vmem>>, vector<8x8xbf16>
    %cst_50 = arith.constant dense<0.000000e+00> : vector<8x8xf32>
    %92 = tpu.matmul %89, %90, %cst_50 {dimension_numbers = #tpu.dot_dimension_numbers<[1], [1], [0], [0], [0, 0, 1, 0], [], []>} : vector<8x8xbf16>, vector<8x8xbf16>, vector<8x8xf32> -> vector<8x8xf32>
    %cst_51 = arith.constant -1.000000e+30 : f32
    %93 = vector.broadcast %cst_51 : f32 to vector<8x8xf32>
    %94 = arith.select %50, %92, %93 : vector<8x8xi1>, vector<8x8xf32>
    %cst_52 = arith.constant dense<0xFF800000> : vector<8xf32>
    %95 = vector.multi_reduction <maximumf>, %94, %cst_52 [1] : vector<8x8xf32> to vector<8xf32>
    %96 = vector.shape_cast %95 : vector<8xf32> to vector<8x1xf32>
    %97 = vector.broadcast %96 : vector<8x1xf32> to vector<8x8xf32>
    %98 = arith.subf %94, %97 : vector<8x8xf32>
    %99 = math.exp %98 : vector<8x8xf32>
    %cst_53 = arith.constant dense<0.000000e+00> : vector<8xf32>
    %100 = vector.multi_reduction <add>, %99, %cst_53 [1] : vector<8x8xf32> to vector<8xf32>
    %101 = vector.shape_cast %100 : vector<8xf32> to vector<8x1xf32>
    %102 = arith.truncf %99 : vector<8x8xf32> to vector<8x8xbf16>
    %cst_54 = arith.constant dense<0.000000e+00> : vector<8x8xf32>
    %103 = tpu.matmul %102, %91, %cst_54 {dimension_numbers = #tpu.dot_dimension_numbers<[1], [0], [0], [1], [0, 0, 1, 1], [], []>} : vector<8x8xbf16>, vector<8x8xbf16>, vector<8x8xf32> -> vector<8x8xf32>
    %104 = vector.broadcast %101 : vector<8x1xf32> to vector<8x8xf32>
    %105 = arith.divf %103, %104 : vector<8x8xf32>
    %106 = arith.truncf %105 : vector<8x8xf32> to vector<8x8xbf16>
    %c0_55 = arith.constant 0 : index
    %c16_56 = arith.constant 16 : index
    %107 = vector.load %arg14[%c0_55, %c16_56] : memref<8x32xbf16, #tpu.memory_space<vmem>>, vector<8x8xbf16>
    tpu.vector_store %arg14[%c0_55, %c16_56], %106 {strides = array<i32>} : memref<8x32xbf16, #tpu.memory_space<vmem>>, vector<8x8xbf16>,
    %c0_57 = arith.constant 0 : index
    %c24 = arith.constant 24 : index
    %108 = vector.load %arg13[%c0_57, %c24] : memref<8x32xbf16, #tpu.memory_space<vmem>>, vector<8x8xbf16>
    %c0_58 = arith.constant 0 : index
    %c24_59 = arith.constant 24 : index
    %109 = vector.load %arg11[%c0_58, %c24_59] : memref<8x32xbf16, #tpu.memory_space<vmem>>, vector<8x8xbf16>
    %c0_60 = arith.constant 0 : index
    %c24_61 = arith.constant 24 : index
    %110 = vector.load %arg12[%c0_60, %c24_61] : memref<8x32xbf16, #tpu.memory_space<vmem>>, vector<8x8xbf16>
    %cst_62 = arith.constant dense<0.000000e+00> : vector<8x8xf32>
    %111 = tpu.matmul %108, %109, %cst_62 {dimension_numbers = #tpu.dot_dimension_numbers<[1], [1], [0], [0], [0, 0, 1, 0], [], []>} : vector<8x8xbf16>, vector<8x8xbf16>, vector<8x8xf32> -> vector<8x8xf32>
    %cst_63 = arith.constant -1.000000e+30 : f32
    %112 = vector.broadcast %cst_63 : f32 to vector<8x8xf32>
    %113 = arith.select %50, %111, %112 : vector<8x8xi1>, vector<8x8xf32>
    %cst_64 = arith.constant dense<0xFF800000> : vector<8xf32>
    %114 = vector.multi_reduction <maximumf>, %113, %cst_64 [1] : vector<8x8xf32> to vector<8xf32>
    %115 = vector.shape_cast %114 : vector<8xf32> to vector<8x1xf32>
    %116 = vector.broadcast %115 : vector<8x1xf32> to vector<8x8xf32>
    %117 = arith.subf %113, %116 : vector<8x8xf32>
    %118 = math.exp %117 : vector<8x8xf32>
    %cst_65 = arith.constant dense<0.000000e+00> : vector<8xf32>
    %119 = vector.multi_reduction <add>, %118, %cst_65 [1] : vector<8x8xf32> to vector<8xf32>
    %120 = vector.shape_cast %119 : vector<8xf32> to vector<8x1xf32>
    %121 = arith.truncf %118 : vector<8x8xf32> to vector<8x8xbf16>
    %cst_66 = arith.constant dense<0.000000e+00> : vector<8x8xf32>
    %122 = tpu.matmul %121, %110, %cst_66 {dimension_numbers = #tpu.dot_dimension_numbers<[1], [0], [0], [1], [0, 0, 1, 1], [], []>} : vector<8x8xbf16>, vector<8x8xbf16>, vector<8x8xf32> -> vector<8x8xf32>
    %123 = vector.broadcast %120 : vector<8x1xf32> to vector<8x8xf32>
    %124 = arith.divf %122, %123 : vector<8x8xf32>
    %125 = arith.truncf %124 : vector<8x8xf32> to vector<8x8xbf16>
    %c0_67 = arith.constant 0 : index
    %c24_68 = arith.constant 24 : index
    %126 = vector.load %arg14[%c0_67, %c24_68] : memref<8x32xbf16, #tpu.memory_space<vmem>>, vector<8x8xbf16>
    tpu.vector_store %arg14[%c0_67, %c24_68], %125 {strides = array<i32>} : memref<8x32xbf16, #tpu.memory_space<vmem>>, vector<8x8xbf16>,
    %c0_69 = arith.constant 0 : index
    %c0_70 = arith.constant 0 : index
    %127 = vector.load %arg14[%c0_69, %c0_70] : memref<8x32xbf16, #tpu.memory_space<vmem>>, vector<8x32xbf16>
    %c0_71 = arith.constant 0 : index
    %c0_72 = arith.constant 0 : index
    %128 = vector.load %arg7[%c0_71, %c0_72] : memref<32x32xbf16, #tpu.memory_space<vmem>>, vector<32x32xbf16>
    %cst_73 = arith.constant dense<0.000000e+00> : vector<8x32xf32>
    %129 = tpu.matmul %127, %128, %cst_73 {dimension_numbers = #tpu.dot_dimension_numbers<[1], [0], [0], [1], [0, 0, 1, 1], [], []>} : vector<8x32xbf16>, vector<32x32xbf16>, vector<8x32xf32> -> vector<8x32xf32>
    %130 = arith.addf %13, %129 : vector<8x32xf32>
    %131 = vector.broadcast %4 : vector<1x32xf32> to vector<8x32xf32>
    %132 = arith.addf %130, %131 : vector<8x32xf32>
    %c0_74 = arith.constant 0 : index
    %c0_75 = arith.constant 0 : index
    %133 = vector.load %arg15[%c0_74, %c0_75] : memref<8x32xf32, #tpu.memory_space<vmem>>, vector<8x32xf32>
    tpu.vector_store %arg15[%c0_74, %c0_75], %132 {strides = array<i32>} : memref<8x32xf32, #tpu.memory_space<vmem>>, vector<8x32xf32>,
    %c0_76 = arith.constant 0 : index
    %c0_77 = arith.constant 0 : index
    %134 = vector.load %arg15[%c0_76, %c0_77] : memref<8x32xf32, #tpu.memory_space<vmem>>, vector<8x32xf32>
    %cst_78 = arith.constant dense<0.000000e+00> : vector<8xf32>
    %135 = vector.multi_reduction <add>, %134, %cst_78 [1] : vector<8x32xf32> to vector<8xf32>
    %136 = vector.shape_cast %135 : vector<8xf32> to vector<8x1xf32>
    %cst_79 = arith.constant 3.200000e+01 : f32
    %137 = vector.broadcast %cst_79 : f32 to vector<8x1xf32>
    %138 = arith.divf %136, %137 : vector<8x1xf32>
    %139 = vector.broadcast %138 : vector<8x1xf32> to vector<8x32xf32>
    %140 = arith.subf %134, %139 : vector<8x32xf32>
    %141 = arith.mulf %140, %140 : vector<8x32xf32>
    %cst_80 = arith.constant dense<0.000000e+00> : vector<8xf32>
    %142 = vector.multi_reduction <add>, %141, %cst_80 [1] : vector<8x32xf32> to vector<8xf32>
    %143 = vector.shape_cast %142 : vector<8xf32> to vector<8x1xf32>
    %cst_81 = arith.constant 3.200000e+01 : f32
    %144 = vector.broadcast %cst_81 : f32 to vector<8x1xf32>
    %145 = arith.divf %143, %144 : vector<8x1xf32>
    %146 = vector.broadcast %138 : vector<8x1xf32> to vector<8x32xf32>
    %147 = arith.subf %134, %146 : vector<8x32xf32>
    %cst_82 = arith.constant 9.99999974E-6 : f32
    %148 = vector.broadcast %cst_82 : f32 to vector<8x1xf32>
    %149 = arith.addf %145, %148 : vector<8x1xf32>
    %150 = math.rsqrt %149 : vector<8x1xf32>
    %151 = vector.broadcast %150 : vector<8x1xf32> to vector<8x32xf32>
    %152 = arith.mulf %147, %151 : vector<8x32xf32>
    %153 = vector.broadcast %2 : vector<1x32xf32> to vector<8x32xf32>
    %154 = arith.mulf %152, %153 : vector<8x32xf32>
    %155 = vector.broadcast %3 : vector<1x32xf32> to vector<8x32xf32>
    %156 = arith.addf %154, %155 : vector<8x32xf32>
    %157 = arith.truncf %156 : vector<8x32xf32> to vector<8x32xbf16>
    %c0_83 = arith.constant 0 : index
    %c0_84 = arith.constant 0 : index
    %158 = vector.load %arg14[%c0_83, %c0_84] : memref<8x32xbf16, #tpu.memory_space<vmem>>, vector<8x32xbf16>
    tpu.vector_store %arg14[%c0_83, %c0_84], %157 {strides = array<i32>} : memref<8x32xbf16, #tpu.memory_space<vmem>>, vector<8x32xbf16>,
    %c0_85 = arith.constant 0 : index
    %c0_86 = arith.constant 0 : index
    %159 = vector.load %arg14[%c0_85, %c0_86] : memref<8x32xbf16, #tpu.memory_space<vmem>>, vector<8x32xbf16>
    %c0_87 = arith.constant 0 : index
    %c0_88 = arith.constant 0 : index
    %160 = vector.load %arg8[%c0_87, %c0_88] : memref<32x128xbf16, #tpu.memory_space<vmem>>, vector<32x128xbf16>
    %cst_89 = arith.constant dense<0.000000e+00> : vector<8x128xf32>
    %161 = tpu.matmul %159, %160, %cst_89 {dimension_numbers = #tpu.dot_dimension_numbers<[1], [0], [0], [1], [0, 0, 1, 1], [], []>} : vector<8x32xbf16>, vector<32x128xbf16>, vector<8x128xf32> -> vector<8x128xf32>
    %c0_90 = arith.constant 0 : index
    %c0_91 = arith.constant 0 : index
    %162 = vector.load %arg5[%c0_90, %c0_91] : memref<1x128xf32, #tpu.memory_space<vmem>>, vector<1x128xf32>
    %163 = vector.broadcast %162 : vector<1x128xf32> to vector<8x128xf32>
    %164 = arith.addf %161, %163 : vector<8x128xf32>
    %cst_92 = arith.constant 5.000000e-01 : f32
    %165 = vector.broadcast %cst_92 : f32 to vector<8x128xf32>
    %166 = arith.mulf %165, %164 : vector<8x128xf32>
    %cst_93 = arith.constant 4.471500e-02 : f32
    %167 = vector.broadcast %cst_93 : f32 to vector<8x128xf32>
    %168 = arith.mulf %167, %164 : vector<8x128xf32>
    %169 = arith.mulf %168, %164 : vector<8x128xf32>
    %170 = arith.mulf %169, %164 : vector<8x128xf32>
    %171 = arith.addf %164, %170 : vector<8x128xf32>
    %cst_94 = arith.constant 0.797884583 : f32
    %172 = vector.broadcast %cst_94 : f32 to vector<8x128xf32>
    %173 = arith.mulf %172, %171 : vector<8x128xf32>
    %174 = math.tanh %173 : vector<8x128xf32>
    %cst_95 = arith.constant 1.000000e+00 : f32
    %175 = vector.broadcast %cst_95 : f32 to vector<8x128xf32>
    %176 = arith.addf %175, %174 : vector<8x128xf32>
    %177 = arith.mulf %166, %176 : vector<8x128xf32>
    %178 = arith.truncf %177 : vector<8x128xf32> to vector<8x128xbf16>
    %c0_96 = arith.constant 0 : index
    %c0_97 = arith.constant 0 : index
    %179 = vector.load %arg16[%c0_96, %c0_97] : memref<8x128xbf16, #tpu.memory_space<vmem>>, vector<8x128xbf16>
    tpu.vector_store %arg16[%c0_96, %c0_97], %178 {strides = array<i32>} : memref<8x128xbf16, #tpu.memory_space<vmem>>, vector<8x128xbf16>,
    %c0_98 = arith.constant 0 : index
    %c0_99 = arith.constant 0 : index
    %180 = vector.load %arg16[%c0_98, %c0_99] : memref<8x128xbf16, #tpu.memory_space<vmem>>, vector<8x128xbf16>
    %c0_100 = arith.constant 0 : index
    %c0_101 = arith.constant 0 : index
    %181 = vector.load %arg9[%c0_100, %c0_101] : memref<128x32xbf16, #tpu.memory_space<vmem>>, vector<128x32xbf16>
    %cst_102 = arith.constant dense<0.000000e+00> : vector<8x32xf32>
    %182 = tpu.matmul %180, %181, %cst_102 {dimension_numbers = #tpu.dot_dimension_numbers<[1], [0], [0], [1], [0, 0, 1, 1], [], []>} : vector<8x128xbf16>, vector<128x32xbf16>, vector<8x32xf32> -> vector<8x32xf32>
    %c0_103 = arith.constant 0 : index
    %c0_104 = arith.constant 0 : index
    %183 = vector.load %arg15[%c0_103, %c0_104] : memref<8x32xf32, #tpu.memory_space<vmem>>, vector<8x32xf32>
    %184 = arith.addf %183, %182 : vector<8x32xf32>
    %185 = vector.broadcast %5 : vector<1x32xf32> to vector<8x32xf32>
    %186 = arith.addf %184, %185 : vector<8x32xf32>
    %c0_105 = arith.constant 0 : index
    %c0_106 = arith.constant 0 : index
    %c0_107 = arith.constant 0 : index
    %187 = vector.load %arg10[%c0_105, %c0_106, %c0_107] : memref<1x8x32xf32, #tpu.memory_space<vmem>>, vector<1x8x32xf32>
    %188 = vector.shape_cast %187 : vector<1x8x32xf32> to vector<8x32xf32>
    %189 = vector.shape_cast %186 : vector<8x32xf32> to vector<1x8x32xf32>
    tpu.vector_store %arg10[%c0_105, %c0_106, %c0_107], %189 {strides = array<i32>} : memref<1x8x32xf32, #tpu.memory_space<vmem>>, vector<1x8x32xf32>,
    return
  }
  func.func @transform_0(%arg0: i32, %arg1: i32) -> (i32, i32, i32) {
    %c0_i32 = arith.constant 0 : i32
    %c0_i32_0 = arith.constant 0 : i32
    %c0_i32_1 = arith.constant 0 : i32
    return %arg0, %c0_i32, %c0_i32_0 : i32, i32, i32
  }
  func.func @transform_1(%arg0: i32, %arg1: i32) -> (i32, i32) {
    %c0_i32 = arith.constant 0 : i32
    %c0_i32_0 = arith.constant 0 : i32
    %c0_i32_1 = arith.constant 0 : i32
    return %c0_i32, %c0_i32_0 : i32, i32
  }
  func.func @transform_2(%arg0: i32, %arg1: i32) -> (i32, i32) {
    %c0_i32 = arith.constant 0 : i32
    %c0_i32_0 = arith.constant 0 : i32
    %c0_i32_1 = arith.constant 0 : i32
    return %c0_i32, %c0_i32_0 : i32, i32
  }
  func.func @transform_3(%arg0: i32, %arg1: i32) -> (i32, i32) {
    %c0_i32 = arith.constant 0 : i32
    %c0_i32_0 = arith.constant 0 : i32
    %c0_i32_1 = arith.constant 0 : i32
    return %c0_i32, %c0_i32_0 : i32, i32
  }
  func.func @transform_4(%arg0: i32, %arg1: i32) -> (i32, i32) {
    %c0_i32 = arith.constant 0 : i32
    %c0_i32_0 = arith.constant 0 : i32
    %c0_i32_1 = arith.constant 0 : i32
    return %c0_i32, %c0_i32_0 : i32, i32
  }
  func.func @transform_5(%arg0: i32, %arg1: i32) -> (i32, i32) {
    %c0_i32 = arith.constant 0 : i32
    %c0_i32_0 = arith.constant 0 : i32
    %c0_i32_1 = arith.constant 0 : i32
    return %c0_i32, %c0_i32_0 : i32, i32
  }
  func.func @transform_6(%arg0: i32, %arg1: i32) -> (i32, i32) {
    %c0_i32 = arith.constant 0 : i32
    %c0_i32_0 = arith.constant 0 : i32
    %c0_i32_1 = arith.constant 0 : i32
    return %c0_i32, %c0_i32_0 : i32, i32
  }
  func.func @transform_7(%arg0: i32, %arg1: i32) -> (i32, i32) {
    %c0_i32 = arith.constant 0 : i32
    %c0_i32_0 = arith.constant 0 : i32
    %c0_i32_1 = arith.constant 0 : i32
    return %c0_i32, %c0_i32_0 : i32, i32
  }
  func.func @transform_8(%arg0: i32, %arg1: i32) -> (i32, i32, i32) {
    %c0_i32 = arith.constant 0 : i32
    %c0_i32_0 = arith.constant 0 : i32
    return %arg0, %arg1, %c0_i32 : i32, i32, i32
  }
}

</mosaic_0001>

<bundles_post_ra>
// kernel: tpu_custom_call.1
= control target key start
LH: loop header
LB: loop body
LE: loop exit
PB: predicated region body
PF: predicated region fallthrough
CT: control target
= control target key end

     0   :  { %13 = vsyncpa [#allocation9], 0  ;;  %s2268_s0 = inlined_call_operand.vmem [shape: f32[2,8,32], index: 0, kind: input, shape index: {}]   ;;  %s2269_s1 = inlined_call_operand.vmem [shape: f32[6,32], index: 1, kind: input, shape index: {}]   ;;  %s2270_s2 = inlined_call_operand.vmem [shape: f32[1,96], index: 2, kind: input, shape index: {}]   ;;  %s2271_s3 = inlined_call_operand.vmem [shape: f32[1,128], index: 3, kind: input, shape index: {}]   ;;  %s2272_s4 = inlined_call_operand.vmem [shape: bf16[32,96], index: 4, kind: input, shape index: {}]   ;;  %s2273_s5 = inlined_call_operand.vmem [shape: bf16[32,32], index: 5, kind: input, shape index: {}]   ;;  %s2274_s6 = inlined_call_operand.vmem [shape: bf16[32,128], index: 6, kind: input, shape index: {}]   ;;  %s2275_s7 = inlined_call_operand.vmem [shape: bf16[128,32], index: 7, kind: input, shape index: {}]   ;;  %s2276_s8 = inlined_call_operand.hbm [shape: f32[2,8,32], index: 8, kind: output, shape index: {}]  }
   0x1   :  { %15 = vsyncpa [#allocation9 + $0x1], 0  ;;  %s1949_s27 = smov 0   ;;  %s1951_s28 = smov 0  }
   0x2   :  { %s1953_s29 = smov 0   ;;  %s1955_s30 = smov 0  }
   0x3   :  { %s1957_s9 = smov 0   ;;  %s1959_s10 = smov 0  }
   0x4 LB: > { %s1482_s11 = sadd.s32 4294967295, %s1891_s10   ;;  %s1483_s12 = sadd.s32 4294967294, %s1891_s10   ;;  %s1891_s10 = sphi %s1959_s10, %s21_s10   ;;  %s1887_s9 = sphi %s1957_s9, %s2283_s9   ;;  %s1883_s30 = sphi %s1955_s30, %s2282_s30   ;;  %s1879_s29 = sphi %s1953_s29, %s2281_s29   ;;  %s1875_s28 = sphi %s1951_s28, %s2280_s28   ;;  %s1871_s27 = sphi %s1949_s27, %s2279_s27  }
   0x5   : > { %s33_s13 = sadd.s32 1, %s1887_s9  ;;  %s215_s14 = sadd.s32 1, %s1879_s29 }
   0x6   : > { %p35_p0 = scmp.ge.s32.totalorder %s33_s13, 2  ;;  %p225_p1 = scmp.ne.s32.totalorder %s1879_s29, %s1875_s28 }
   0x7   : > { %p226_p2 = scmp.eq.s32.totalorder %s1482_s11, 1  ;;  %p231_p3 = scmp.ne.s32.totalorder %s1875_s28, %s1871_s27 }
   0x8   : > { %s2285_s13 = smov (%p35_p0, %s33_s13), 0  ;;  %p232_p5 = scmp.eq.s32.totalorder %s1483_s12, 1 }
   0x9   : > { %p1989_p4 = por %p226_p2, %p225_p1  ;;  %s210_s16 = ssub.s32 %s1887_s9, %s2285_s13 }
   0xa   : > { %p1486_p6 = scmp.ge.s32.totalorder %s1891_s10, 1  ;;  %p213_p7 = scmp.eq.s32.totalorder %s210_s16, 0 }
   0xb   : > { %p1996_p8 = por %p232_p5, %p231_p3  ;;  %p278_p9 = scmp.lt.s32.totalorder %s1891_s10, 3 }
   0xc   : > { %s2002_s18 = scalar_select %p213_p7, %s1879_s29, %s215_s14  }
   0xd   : > { %p279_p10 = pnand %p1486_p6, %p278_p9 }
   0xe   : > { %p311_p11 = scmp.lt.s32.totalorder (!%p279_p10), %s1883_s30, 1  ;;  %v1763_v0 = vld [vmem:[%s2272_s4 + $0x8] sm:$0xff] (!%p279_p10)   ;;  %vm327_vm0 = vcmask (!%p279_p10), 261120   ;;  %s1893_s23 = smov (!%p279_p10), 96   ;;  %v1762_v3 = vld [vmem:[%s2272_s4] sm:$0xff] (!%p279_p10)   ;;  %v1894_v4 = vmov (!%p279_p10), 0.0  }
   0xf   : > { %282 = sbr.rel (%p279_p10) target bundleno = 2496 (0x9c0), region = 52  ;;  %375 = vrot.lane.b32.xlu1 (!%p279_p10), %v1763_v0, %s1893_s23  ;;  %1589 = vmatprep.subr.bf16.mxu0 (!%p279_p10), %v1894_v4  ;;  %v1764_v13 = vld [vmem:[%s2272_s4] sm:$0xff] (!%p279_p10)   ;;  %vm1896_vm1 = vmmov (!%p279_p10), 0   ;;  %v1765_v18 = vld [vmem:[%s2272_s4 + $0x8] sm:$0xff] (!%p279_p10)   ;;  %vm426_vm2 = vcmask (!%p279_p10), 257024   ;;  %vm607_vm3 = vcmask (!%p279_p10), 64512  }
  0x10   : > { %1613 = vmatprep.subr.bf16.mxu1 (!%p279_p10), %v1894_v4  ;;  %1593 = vmatprep.mubr.msk.bf16.mxu0 (!%p279_p10), %vm1896_vm1, %v1894_v4  ;;  %v2044_v19 = vld [vmem:[%s2270_s2] ss:$0 sm:$0xff] (!%p279_p10)  ;;  %v1548_v26 = vld [vmem:[%s2269_s1 + $0x1] ss:$0 sm:$0xff] (!%p279_p10)  ;;  %v1767_v36 = vld [vmem:[%s2272_s4 + $0x8] sm:$0xff] (!%p279_p10)   ;;  %s1897_s21 = smov (!%p279_p10), 120  }
  0x11   : > { %1615 = vmatprep.mubr.msk.bf16.mxu1 (!%p279_p10), %vm1896_vm1, %v1894_v4  ;;  %v1547_v24 = vld [vmem:[%s2269_s1] ss:$0 sm:$0xff] (!%p279_p10)  ;;  %s1899_s24 = smov (!%p279_p10), 104   ;;  %vm668_vm4 = vcmask (!%p279_p10), 1043456   ;;  %vm715_vm6 = vcmask (!%p279_p10), 60416   ;;  %s1902_s14 = smov (!%p279_p10), 24  }
  0x12   : > { %v1766_v35 = vld [vmem:[%s2272_s4] sm:$0xff] (!%p279_p10)   ;;  %vm847_vm7 = vcmask (!%p279_p10), 126016   ;;  %vm979_vm8 = vcmask (!%p279_p10), 191616   ;;  %vm1111_vm9 = vcmask (!%p279_p10), 257216   ;;  %s1541_s11 = sshll.u32 (!%p279_p10), %s1883_s30, 7 }
  0x13   : > { %s2220_s20 = scalar_lea.hbm (!%p279_p10), %s2276_s8, %s1541_s11 }
  0x16   : > { %s312_s19 = scalar_select %p311_p11, %s1883_s30, 1 }
  0x18   : > { %s1488_s22 = sshll.u32 %s312_s19, 3  ;;  %s1895_s19 = smov 64  }
  0x19   : > { %s314_s26 = scalar_lea.vmem %s2268_s0, %s1488_s22  ;;  %s1898_s22 = smov 112  }
  0x1a   : > { %v2013_v1 = vld [vmem:[%s314_s26] sm:$0xff] }
  0x1b   : > { %v328_v2 = vsel %vm327_vm0, %v2013_v1, 0.0 }
  0x1c   : > { %329 = vadd.xlane.f32.xlu0 %v328_v2 }
  0x20   : > { %504 = vadd.xlane.f32.xlu0 %v328_v2 }
  0x36   : > { %373 = vrot.lane.b32.xlu0 %v1762_v3, %s1893_s23 }
  0x3a   : > { %379 = vrot.lane.b32.xlu0 %v2044_v19, %s1893_s23  ;;  %s1901_s23 = smov 16  }
  0x81   : > { %v376_v12 = vpop.permute.xlu1 %375 }
  0xa9   : > { %v330_v5 = vpop.xlane.xlu0 %329 }
  0xaa   : > { %v332_v6 = vmul.f32 0.03125, %v330_v5 }
  0xac   : > { %v333_v7 = vsub.f32 %v2013_v1, %v332_v6 }
  0xad   : > { %v505_v8 = vpop.xlane.xlu0 %504 }
  0xae   : > { %v334_v9 = vmul.f32 %v333_v7, %v333_v7  ;;  %v507_v14 = vmul.f32 0.03125, %v505_v8 }
  0xb0   : > { %v335_v10 = vsel %vm327_vm0, %v334_v9, 0.0  ;;  %v508_v15 = vsub.f32 %v2013_v1, %v507_v14 }
  0xb1   : > { %336 = vadd.xlane.f32.xlu1 %v335_v10  ;;  %v374_v11 = vpop.permute.xlu0 %373 }
  0xb2   : > { %1590 = vmatpush3.bf16.msra.mxu0 %v374_v11  ;;  %v509_v16 = vmul.f32 %v508_v15, %v508_v15 }
  0xb3   : > { %1591 = vmatprep.subr.bf16.mxu0 %v1894_v4 }
  0xb4   : > { %v510_v17 = vsel %vm327_vm0, %v509_v16, 0.0 }
  0xb5   : > { %v380_v42 = vpop.permute.xlu0 %379 }
  0xb6   : > { %1592 = vmatpush3.bf16.msra.mxu0 %v376_v12 }
  0xb7   : > { %1597 = vmatprep.subr.bf16.mxu0 %v1894_v4 }
  0xc2   : > { %448 = vrot.lane.b32.xlu1 %v1764_v13, %s1895_s19 }
  0xe6   : > { %511 = vadd.xlane.f32.xlu1 %v510_v17 }
  0xf7   : > { %450 = vrot.lane.b32.xlu1 %v1765_v18, %s1895_s19 }
 0x13e   : > { %v337_v20 = vpop.xlane.xlu1 %336 }
 0x13f   : > { %v338_v21 = vmul.f32 0.03125, %v337_v20  ;;  %v342_v20 = vlaneseq }
 0x141   : > { %v339_v22 = vadd.f32 1e-05, %v338_v21  ;;  %v343_v21 = vshrl.u32 %v342_v20, 7 }
 0x142   : > { %v449_v30 = vpop.permute.xlu1 %448 }
 0x143   : > { %1789 = vrsqrt.f32 %v339_v22  ;;  %v602_v22 = vand.u32 127, %v342_v20 }
 0x145   : > { %vm603_vm5 = vcmp.le.s32.totalorder %v602_v22, %v343_v21 }
 0x14d   : > { %v1790_v23 = vpop.eup %1789 }
 0x14e   : > { %v341_v25 = vmul.f32 %v1790_v23, %v333_v7 }
 0x150   : > { %v346_v27 = vmul.f32 %v1547_v24, %v341_v25 }
 0x152   : > { %v351_v28 = vadd.f32 %v1548_v26, %v346_v27 }
 0x154   : > { %v352_v29 = vpack.c.bf16 %v351_v28, %v351_v28 }
 0x156   : > { %1594 = vmatmul.mubr.msk.bf16.vlgmr.msra.gmra.mrb[0].mxu0 %vm327_vm0, %v352_v29 }
 0x157   : > { %1598 = vmatpush3.bf16.msra.mxu0 %v449_v30  ;;  %1601 = vmatprep.mubr.msk.bf16.mxu0 %vm1896_vm1, %v1894_v4 }
 0x158   : > { %1599 = vmatprep.subr.bf16.mxu0 %v1894_v4 }
 0x173   : > { %v512_v31 = vpop.xlane.xlu1 %511 }
 0x174   : > { %v513_v32 = vmul.f32 0.03125, %v512_v31 }
 0x176   : > { %v514_v33 = vadd.f32 1e-05, %v513_v32 }
 0x177   : > { %v451_v34 = vpop.permute.xlu1 %450 }
 0x178   : > { %1791 = vrsqrt.f32 %v514_v33  ;;  %1600 = vmatpush3.bf16.msra.mxu0 %v451_v34 }
 0x179   : > { %1605 = vmatprep.subr.bf16.mxu0 %v1894_v4 }
 0x17b   : > { %1602 = vmatmul.mubr.msk.bf16.vlgmr.msra.gmra.mrb[4].mxu0 %vm327_vm0, %v352_v29 }
 0x17c   : > { %1606 = vmatpush3.bf16.msra.mxu0 %v1766_v35  ;;  %1609 = vmatprep.mubr.msk.bf16.mxu0 %vm1896_vm1, %v1894_v4 }
 0x17d   : > { %1607 = vmatprep.subr.bf16.mxu0 %v1894_v4 }
 0x180   : > { %1608 = vmatpush3.bf16.msra.mxu0 %v1767_v36 }
 0x181   : > { %1619 = vmatprep.subr.bf16.mxu0 %v1894_v4 }
 0x182   : > { %v1792_v37 = vpop.eup %1791 }
 0x183   : > { %v516_v38 = vmul.f32 %v1792_v37, %v508_v15 }
 0x185   : > { %v521_v39 = vmul.f32 %v1547_v24, %v516_v38 }
 0x187   : > { %v526_v40 = vadd.f32 %v1548_v26, %v521_v39 }
 0x189   : > { %v527_v41 = vpack.c.bf16 %v526_v40, %v526_v40 }
 0x18b   : > { %1610 = vmatmul.mubr.msk.bf16.vlgmr.msra.gmra.mrb[8].mxu0 %vm327_vm0, %v527_v41 }
 0x18c   : > { %1621 = vmatprep.mubr.msk.bf16.mxu0 %vm1896_vm1, %v1894_v4 }
 0x229   : > { %v419_v43 = vpop.f32.mrb[0].mxu0 }
 0x22a   : > { %v420_v44 = vadd.f32 %v419_v43, %v380_v42  ;;  %v1595_v45 = vpop.f32.mrb[1].mxu0 }
 0x22b   : > { %v422_v46 = vpop.f32.mrb[2].mxu0 }
 0x22c   : > { %v425_v47 = vpack.c.bf16 %v420_v44, %v420_v44  ;;  %v1596_v48 = vpop.f32.mrb[3].mxu0 }
 0x22e   : > { %427 = vst.msk [vmem:[#allocation2] sm:$0xf] %vm426_vm2, %v425_v47 }
 0x235   : > { %v605_v49 = vld [vmem:[#allocation2] sm:$0xf] }
 0x236   : > { %v1768_v50 = vld [vmem:[#allocation2] ss:$0 sps:$4 sm:$0xff]   ;;  %v612_v51 = vsel %vm607_vm3, %v605_v49, 0 }
 0x237   : > { %1614 = vmatpush3.bf16.xpose.msra.mxu1 %v612_v51  ;;  %728 = vrot.lane.b32.xlu1 %v1768_v50, %s1897_s21  ;;  %v1769_v52 = vld [vmem:[#allocation2] ss:$0 sps:$4 sm:$0xff]  }
 0x238   : > { %1625 = vmatprep.subr.bf16.mxu1 %v1894_v4  ;;  %v1770_v53 = vld [vmem:[#allocation2] ss:$0 sps:$4 sm:$0xff]  }
 0x23b   : > { %860 = vrot.lane.b32.xlu1 %v1769_v52, %s1898_s22 }
 0x23f   : > { %992 = vrot.lane.b32.xlu1 %v1770_v53, %s1899_s24 }
 0x243   : > { %454 = vrot.lane.b32.xlu1 %v2044_v19, %s1895_s19  ;;  %s1900_s19 = smov 8  }
 0x24e   : > { %v491_v54 = vpop.f32.mrb[4].mxu0 }
 0x24f   : > { %v1603_v55 = vpop.f32.mrb[5].mxu0 }
 0x250   : > { %v494_v56 = vpop.f32.mrb[6].mxu0 }
 0x251   : > { %v1604_v57 = vpop.f32.mrb[7].mxu0 }
 0x25e   : > { %v588_v58 = vpop.f32.mrb[8].mxu0 }
 0x25f   : > { %v589_v59 = vadd.f32 %v2044_v19, %v588_v58  ;;  %v1611_v60 = vpop.f32.mrb[9].mxu0 }
 0x260   : > { %v591_v61 = vpop.f32.mrb[10].mxu0 }
 0x261   : > { %v594_v62 = vpack.c.bf16 %v589_v59, %v589_v59  ;;  %v1612_v63 = vpop.f32.mrb[11].mxu0 }
 0x263   : > { %596 = vst.msk [vmem:[#allocation4] sm:$0xf] %vm426_vm2, %v594_v62 }
 0x26a   : > { %v604_v0 = vld [vmem:[#allocation4] sm:$0xf] }
 0x26b   : > { %v1771_v2 = vld [vmem:[#allocation4] ss:$0 sps:$4 sm:$0xff]   ;;  %1616 = vmatmul.mubr.msk.bf16.vlgmr.msra.gmra.mrb[0].mxu1 %vm607_vm3, %v604_v0 }
 0x26c   : > { %723 = vrot.lane.b32.xlu0 %v1771_v2, %s1897_s21  ;;  %1627 = vmatprep.mubr.msk.bf16.mxu1 %vm1896_vm1, %v1894_v4  ;;  %v1772_v3 = vld [vmem:[#allocation4] ss:$0 sps:$4 sm:$0xff]  }
 0x26d   : > { %v1773_v5 = vld [vmem:[#allocation4] ss:$0 sps:$4 sm:$0xff]  }
 0x270   : > { %855 = vrot.lane.b32.xlu0 %v1772_v3, %s1898_s22 }
 0x274   : > { %987 = vrot.lane.b32.xlu0 %v1773_v5, %s1899_s24 }
 0x2a9   : > { %v729_v6 = vpop.permute.xlu1 %728 }
 0x2aa   : > { %v734_v7 = vsel %vm607_vm3, %v729_v6, 0 }
 0x2ab   : > { %1626 = vmatpush3.bf16.xpose.msra.mxu1 %v734_v7 }
 0x2ac   : > { %1637 = vmatprep.subr.bf16.mxu1 %v1894_v4 }
 0x2ad   : > { %v861_v8 = vpop.permute.xlu1 %860 }
 0x2ae   : > { %v866_v16 = vsel %vm607_vm3, %v861_v8, 0 }
 0x2b1   : > { %v993_v9 = vpop.permute.xlu1 %992 }
 0x2b2   : > { %v998_v18 = vsel %vm607_vm3, %v993_v9, 0 }
 0x2b5   : > { %v455_v10 = vpop.permute.xlu1 %454 }
 0x2b6   : > { %v492_v11 = vadd.f32 %v491_v54, %v455_v10 }
 0x2b8   : > { %v497_v12 = vpack.c.bf16 %v492_v11, %v492_v11 }
 0x2ba   : > { %498 = vst.msk [vmem:[#allocation3] sm:$0xf] %vm426_vm2, %v497_v12 }
 0x2c1   : > { %v606_v13 = vld [vmem:[#allocation3] sm:$0xf] }
 0x2c2   : > { %v670_v14 = vsel %vm668_vm4, %v606_v13, 0  ;;  %v1774_v46 = vld [vmem:[#allocation3] ss:$0 sps:$4 sm:$0xff]  }
 0x2c3   : > { %1620 = vmatpush3.bf16.msra.mxu0 %v670_v14  ;;  %v1775_v48 = vld [vmem:[#allocation3] ss:$0 sps:$4 sm:$0xff]  }
 0x2c4   : > { %1631 = vmatprep.subr.bf16.mxu0 %v1894_v4  ;;  %v1776_v52 = vld [vmem:[#allocation3] ss:$0 sps:$4 sm:$0xff]  }
 0x2de   : > { %v724_v15 = vpop.permute.xlu0 %723 }
 0x2df   : > { %1628 = vmatmul.mubr.msk.bf16.vlgmr.msra.gmra.mrb[4].mxu1 %vm607_vm3, %v724_v15 }
 0x2e0   : > { %1638 = vmatpush3.bf16.xpose.msra.mxu1 %v866_v16  ;;  %1639 = vmatprep.mubr.msk.bf16.mxu1 %vm1896_vm1, %v1894_v4 }
 0x2e1   : > { %1649 = vmatprep.subr.bf16.mxu1 %v1894_v4 }
 0x2e2   : > { %v856_v17 = vpop.permute.xlu0 %855 }
 0x2e6   : > { %v988_v19 = vpop.permute.xlu0 %987 }
 0x2e7   : > { %1640 = vmatmul.mubr.msk.bf16.vlgmr.msra.gmra.mrb[8].mxu1 %vm607_vm3, %v856_v17 }
 0x2e8   : > { %1650 = vmatpush3.bf16.xpose.msra.mxu1 %v998_v18  ;;  %1651 = vmatprep.mubr.msk.bf16.mxu1 %vm1896_vm1, %v1894_v4 }
 0x2e9   : > { %1661 = vmatprep.subr.bf16.mxu1 %v1894_v4 }
 0x2ef   : > { %1652 = vmatmul.mubr.msk.bf16.vlgmr.msra.gmra.mrb[12].mxu1 %vm607_vm3, %v988_v19 }
 0x2f0   : > { %1665 = vmatprep.mubr.msk.bf16.mxu1 %vm1896_vm1, %v1894_v4 }
 0x33e   : > { %v648_v23 = vpop.f32.mrb[0].mxu1 }
 0x33f   : > { %v654_v24 = vsel %vm603_vm5, %v648_v23, -1e+30  ;;  %v1617_v25 = vpop.f32.mrb[1].mxu1 }
 0x340   : > { %v651_v26 = vpop.f32.mrb[2].mxu1  ;;  %v655_v27 = vsel %vm607_vm3, %v654_v24, -inf }
 0x341   : > { %656 = vmax.xlane.f32.xlu0 %v655_v27  ;;  %v1618_v28 = vpop.f32.mrb[3].mxu1 }
 0x3b2   : > { %v770_v29 = vpop.f32.mrb[4].mxu1 }
 0x3b3   : > { %v776_v30 = vsel %vm603_vm5, %v770_v29, -1e+30  ;;  %v1629_v31 = vpop.f32.mrb[5].mxu1 }
 0x3b4   : > { %v773_v32 = vpop.f32.mrb[6].mxu1  ;;  %v777_v33 = vsel %vm607_vm3, %v776_v30, -inf }
 0x3b5   : > { %778 = vmax.xlane.f32.xlu1 %v777_v33  ;;  %v1630_v34 = vpop.f32.mrb[7].mxu1 }
 0x3ba   : > { %v902_v35 = vpop.f32.mrb[8].mxu1 }
 0x3bb   : > { %v908_v36 = vsel %vm603_vm5, %v902_v35, -1e+30  ;;  %v1641_v37 = vpop.f32.mrb[9].mxu1 }
 0x3bc   : > { %v905_v38 = vpop.f32.mrb[10].mxu1  ;;  %v909_v39 = vsel %vm607_vm3, %v908_v36, -inf }
 0x3bd   : > { %910 = vmax.xlane.f32.xlu0 %v909_v39  ;;  %v1642_v40 = vpop.f32.mrb[11].mxu1  ;;  %v1777_v38 = vld [vmem:[%s2273_s5] sm:$0xff]  }
 0x3be   : > { %1662 = vmatpush3.bf16.msra.mxu1 %v1777_v38 }
 0x3bf   : > { %1663 = vmatprep.subr.bf16.mxu1 %v1894_v4 }
 0x3c2   : > { %v1034_v41 = vpop.f32.mrb[12].mxu1 }
 0x3c3   : > { %v1040_v42 = vsel %vm603_vm5, %v1034_v41, -1e+30  ;;  %v1653_v43 = vpop.f32.mrb[13].mxu1 }
 0x3c4   : > { %v1037_v44 = vpop.f32.mrb[14].mxu1  ;;  %v1041_v45 = vsel %vm607_vm3, %v1040_v42, -inf }
 0x3c5   : > { %1042 = vmax.xlane.f32.xlu0 %v1041_v45  ;;  %v1654_v47 = vpop.f32.mrb[15].mxu1 }
 0x3c6   : > { %922 = vrot.lane.b32.xlu1 %v1774_v46, %s1898_s22  ;;  %s1903_s22 = smov [#allocation8]  }
 0x3ca   : > { %1054 = vrot.lane.b32.xlu1 %v1775_v48, %s1899_s24  ;;  %s308_s24 = sand.u32 1, %s1875_s28  }
 0x3cb   : > { %s1398_s30 = scalar_lea.sflag [#allocation9], %s308_s24 }
 0x3ce   : > { %v657_v49 = vpop.xlane.xlu0 %656 }
 0x3cf   : > { %v658_v50 = vsub.f32 %v654_v24, %v657_v49 }
 0x3d1   : > { %v659_v51 = vmul.f32 1.442695, %v658_v50 }
 0x3d3   : > { %1793 = vpow2.f32 %v659_v51 }
 0x3db   : > { %790 = vrot.lane.b32.xlu0 %v1776_v52, %s1897_s21 }
 0x3dd   : > { %v1794_v53 = vpop.eup %1793 }
 0x3de   : > { %v664_v54 = vpack.c.bf16 %v1794_v53, %v1794_v53  ;;  %v661_v16 = vsel %vm607_vm3, %v1794_v53, 0.0 }
 0x3e0   : > { %1622 = vmatmul.mubr.msk.bf16.vlgmr.msra.gmra.mrb[12].mxu0 %vm607_vm3, %v664_v54 }
 0x3e1   : > { %1633 = vmatprep.mubr.msk.bf16.mxu0 %vm1896_vm1, %v1894_v4 }
 0x442   : > { %v779_v55 = vpop.xlane.xlu1 %778 }
 0x443   : > { %v780_v56 = vsub.f32 %v776_v30, %v779_v55 }
 0x445   : > { %v781_v57 = vmul.f32 1.442695, %v780_v56  ;;  %v1524_v56 = vld [vmem:[%s2269_s1 + $0x4] ss:$0 sm:$0xff] }
 0x446   : > { %v923_v6 = vpop.permute.xlu1 %922 }
 0x447   : > { %1795 = vpow2.f32 %v781_v57  ;;  %v928_v10 = vsel %vm668_vm4, %v923_v6, 0 }
 0x44a   : > { %v911_v58 = vpop.xlane.xlu0 %910  ;;  %v1055_v11 = vpop.permute.xlu1 %1054 }
 0x44b   : > { %v912_v59 = vsub.f32 %v908_v36, %v911_v58  ;;  %v1060_v15 = vsel %vm668_vm4, %v1055_v11, 0 }
 0x44d   : > { %v913_v60 = vmul.f32 1.442695, %v912_v59 }
 0x44f   : > { %1797 = vpow2.f32 %v913_v60 }
 0x451   : > { %v1796_v61 = vpop.eup %1795 }
 0x452   : > { %v1043_v62 = vpop.xlane.xlu0 %1042  ;;  %v783_v63 = vsel %vm607_vm3, %v1796_v61, 0.0  ;;  %v786_v8 = vpack.c.bf16 %v1796_v61, %v1796_v61 }
 0x453   : > { %v1044_v0 = vsub.f32 %v1040_v42, %v1043_v62  ;;  %784 = vadd.xlane.f32.xlu1 %v783_v63  ;;  %v1778_v42 = vld [vmem:[%s2273_s5 + $0x8] sm:$0xff]  }
 0x454   : > { %1664 = vmatpush3.bf16.msra.mxu1 %v1778_v42 }
 0x455   : > { %v1045_v2 = vmul.f32 1.442695, %v1044_v0  ;;  %1677 = vmatprep.subr.bf16.mxu1 %v1894_v4 }
 0x456   : > { %v791_v3 = vpop.permute.xlu0 %790 }
 0x457   : > { %1799 = vpow2.f32 %v1045_v2  ;;  %v796_v5 = vsel %vm668_vm4, %v791_v3, 0 }
 0x458   : > { %1632 = vmatpush3.bf16.msra.mxu0 %v796_v5 }
 0x459   : > { %v1798_v7 = vpop.eup %1797  ;;  %1643 = vmatprep.subr.bf16.mxu0 %v1894_v4 }
 0x45a   : > { %v915_v9 = vsel %vm607_vm3, %v1798_v7, 0.0  ;;  %v918_v13 = vpack.c.bf16 %v1798_v7, %v1798_v7 }
 0x45b   : > { %916 = vadd.xlane.f32.xlu0 %v915_v9  ;;  %1634 = vmatmul.mubr.msk.bf16.vlgmr.msra.gmra.mrb[16].mxu0 %vm607_vm3, %v786_v8  ;;  %v1780_v8 = vld [vmem:[%s2274_s6 + $0x8] sm:$0xff]  }
 0x45c   : > { %1644 = vmatpush3.bf16.msra.mxu0 %v928_v10  ;;  %1645 = vmatprep.mubr.msk.bf16.mxu0 %vm1896_vm1, %v1894_v4 }
 0x45d   : > { %1655 = vmatprep.subr.bf16.mxu0 %v1894_v4 }
 0x461   : > { %v1800_v12 = vpop.eup %1799 }
 0x462   : > { %v1047_v14 = vsel %vm607_vm3, %v1800_v12, 0.0  ;;  %v1050_v17 = vpack.c.bf16 %v1800_v12, %v1800_v12 }
 0x463   : > { %1048 = vadd.xlane.f32.xlu0 %v1047_v14  ;;  %1646 = vmatmul.mubr.msk.bf16.vlgmr.msra.gmra.mrb[20].mxu0 %vm607_vm3, %v918_v13  ;;  %v1525_v13 = vld [vmem:[%s2269_s1 + $0x2] ss:$0 sm:$0xff] }
 0x464   : > { %1656 = vmatpush3.bf16.msra.mxu0 %v1060_v15  ;;  %1657 = vmatprep.mubr.msk.bf16.mxu0 %vm1896_vm1, %v1894_v4  ;;  %v1526_v15 = vld [vmem:[%s2269_s1 + $0x3] ss:$0 sm:$0xff] }
 0x465   : > { %1669 = vmatprep.subr.bf16.mxu0 %v1894_v4 }
 0x467   : > { %662 = vadd.xlane.f32.xlu0 %v661_v16 }
 0x46b   : > { %1658 = vmatmul.mubr.msk.bf16.vlgmr.msra.gmra.mrb[24].mxu0 %vm607_vm3, %v1050_v17 }
 0x46c   : > { %1673 = vmatprep.mubr.msk.bf16.mxu0 %vm1896_vm1, %v1894_v4 }
 0x4b3   : > { %v706_v18 = vpop.f32.mrb[12].mxu0 }
 0x4b4   : > { %v1623_v19 = vpop.f32.mrb[13].mxu0 }
 0x4b5   : > { %v709_v20 = vpop.f32.mrb[14].mxu0 }
 0x4b6   : > { %v1624_v21 = vpop.f32.mrb[15].mxu0  ;;  %v1781_v20 = vld [vmem:[%s2275_s7] sm:$0xff]  }
 0x4b7   : > { %v1782_v21 = vld [vmem:[%s2275_s7 + $0x8] sm:$0xff]  }
 0x4e0   : > { %v785_v28 = vpop.xlane.xlu1 %784 }
 0x4e8   : > { %v917_v22 = vpop.xlane.xlu0 %916 }
 0x4f0   : > { %v1049_v23 = vpop.xlane.xlu0 %1048 }
 0x4f4   : > { %v663_v24 = vpop.xlane.xlu0 %662 }
 0x4f5   : > { %1801 = vrcp.f32 %v663_v24  ;;  %v1785_v24 = vld [vmem:[%s2275_s7 + $0x20] sm:$0xff]  }
 0x4f6   : > { %1803 = vrcp.f32 %v785_v28  ;;  %v1527_v28 = vld [vmem:[%s2271_s3] ss:$0 sm:$0xff] }
 0x4f7   : > { %1805 = vrcp.f32 %v917_v22  ;;  %v1783_v22 = vld [vmem:[%s2275_s7 + $0x10] sm:$0xff]  }
 0x4f8   : > { %1807 = vrcp.f32 %v1049_v23  ;;  %v1784_v23 = vld [vmem:[%s2275_s7 + $0x18] sm:$0xff]  }
 0x4ff   : > { %v1802_v25 = vpop.eup %1801 }
 0x500   : > { %v713_v26 = vmul.f32 %v1802_v25, %v706_v18  ;;  %v1804_v29 = vpop.eup %1803  ;;  %v1786_v25 = vld [vmem:[%s2275_s7 + $0x28] sm:$0xff]  }
 0x501   : > { %v1806_v36 = vpop.eup %1805 }
 0x502   : > { %v714_v27 = vpack.c.bf16 %v713_v26, %v713_v26  ;;  %v1808_v45 = vpop.eup %1807  ;;  %v1787_v26 = vld [vmem:[%s2275_s7 + $0x30] sm:$0xff]  }
 0x504   : > { %716 = vst.msk [vmem:[#allocation5] sm:$0xf] %vm715_vm6, %v714_v27  ;;  %v1788_v27 = vld [vmem:[%s2275_s7 + $0x38] sm:$0xff]  }
 0x52e   : > { %v832_v30 = vpop.f32.mrb[16].mxu0 }
 0x52f   : > { %v839_v31 = vmul.f32 %v1804_v29, %v832_v30  ;;  %v1635_v32 = vpop.f32.mrb[17].mxu0 }
 0x530   : > { %v835_v33 = vpop.f32.mrb[18].mxu0 }
 0x531   : > { %v1544_v34 = vpack.c.bf16 %v839_v31, %v839_v31  ;;  %v1636_v35 = vpop.f32.mrb[19].mxu0 }
 0x533   : > { %844 = vrot.lane.b32.xlu1 %v1544_v34, %s1900_s19  ;;  %s1487_s19 = sshll.u32 %s308_s24, 3 }
 0x534   : > { %s310_s12 = scalar_lea.vmem [#allocation8], %s1487_s19  ;;  %s1817_s19 = sshll.u32 %s1903_s22, 4  ;;  %s1818_s19 = int_to_ptr.vmem [resolvable:$false] %s1817_s19 }
 0x535   : > { %s1819_s25 = scalar_lea.vmem %s1818_s19, 256 }
 0x536   : > { %v964_v37 = vpop.f32.mrb[20].mxu0 }
 0x537   : > { %v971_v39 = vmul.f32 %v1806_v36, %v964_v37  ;;  %v1647_v40 = vpop.f32.mrb[21].mxu0 }
 0x538   : > { %v967_v41 = vpop.f32.mrb[22].mxu0 }
 0x539   : > { %v1545_v43 = vpack.c.bf16 %v971_v39, %v971_v39  ;;  %v1648_v44 = vpop.f32.mrb[23].mxu0 }
 0x53a   : > { %v1539_v44 = vld [vmem:[%s2269_s1 + $0x5] ss:$0 sm:$0xff] }
 0x53b   : > { %976 = vrot.lane.b32.xlu0 %v1545_v43, %s1901_s23  ;;  %s1412_s23 = sshll.u32 %s310_s12, 4  ;;  %s2222_s23 = int_to_ptr.vmem [resolvable:$true] %s1412_s23 }
 0x53c   : > { %s1813_s21 = scalar_lea.vmem %s2222_s23, 128  ;;  %p1820_p1 = scmp.lt.s32.totalorder %s2222_s23, %s1818_s19 }
 0x53d   : > { %p1814_p12 = scmp.ne.s32.totalorder %s2222_s23, %s1813_s21  ;;  %p1821_p2 = scmp.lt.s32.totalorder %s1819_s25, %s1813_s21 }
 0x53e   : > { %v1096_v46 = vpop.f32.mrb[24].mxu0 }
 0x53f   : > { %v1103_v47 = vmul.f32 %v1808_v45, %v1096_v46  ;;  %v1659_v48 = vpop.f32.mrb[25].mxu0  ;;  %p1815_p13 = pnand %p1814_p12, %p1989_p4  ;;  %p1822_p3 = por %p1821_p2, %p1820_p1 }
 0x540   : > { %v1099_v49 = vpop.f32.mrb[26].mxu0 }
 0x541   : > { %v1546_v50 = vpack.c.bf16 %v1103_v47, %v1103_v47  ;;  %v1660_v51 = vpop.f32.mrb[27].mxu0  ;;  %p1816_p0 = pneg %p1815_p13 }
 0x543   : > { %1108 = vrot.lane.b32.xlu1 %v1546_v50, %s1902_s14  ;;  %p1823_p5 = pnand %p1822_p3, %p1816_p0 }
 0x5a5   : > { %v845_v52 = vpop.permute.xlu1 %844 }
 0x5a6   : > { %848 = vst.msk [vmem:[#allocation5] sm:$0xf] %vm847_vm7, %v845_v52 }
 0x5ad   : > { %v977_v53 = vpop.permute.xlu0 %976 }
 0x5ae   : > { %980 = vst.msk [vmem:[#allocation5] sm:$0xf] %vm979_vm8, %v977_v53 }
 0x5b5   : > { %v1109_v54 = vpop.permute.xlu1 %1108 }
 0x5b6   : > { %1112 = vst.msk [vmem:[#allocation5] sm:$0xf] %vm1111_vm9, %v1109_v54 }
 0x5bd   : > { %v1113_v55 = vld [vmem:[#allocation5] sm:$0xf] }
 0x5be   : > { %1666 = vmatmul.mubr.msk.bf16.vlgmr.msra.gmra.mrb[16].mxu1 %vm327_vm0, %v1113_v55 }
 0x5bf   : > { %1693 = vmatprep.mubr.msk.bf16.mxu1 %vm1896_vm1, %v1894_v4  ;;  %1678 = vmatpush3.bf16.msra.mxu1 %v1781_v20 }
 0x5c0   : > { %1679 = vmatprep.subr.bf16.mxu1 %v1894_v4 }
 0x5c3   : > { %1680 = vmatpush3.bf16.msra.mxu1 %v1782_v21 }
 0x5c4   : > { %1681 = vmatprep.subr.bf16.mxu1 %v1894_v4 }
 0x5c7   : > { %1682 = vmatpush3.bf16.msra.mxu1 %v1783_v22 }
 0x5c8   : > { %1683 = vmatprep.subr.bf16.mxu1 %v1894_v4 }
 0x5cb   : > { %1684 = vmatpush3.bf16.msra.mxu1 %v1784_v23 }
 0x5cc   : > { %1685 = vmatprep.subr.bf16.mxu1 %v1894_v4 }
 0x5cf   : > { %1686 = vmatpush3.bf16.msra.mxu1 %v1785_v24 }
 0x5d0   : > { %1687 = vmatprep.subr.bf16.mxu1 %v1894_v4 }
 0x5d3   : > { %1688 = vmatpush3.bf16.msra.mxu1 %v1786_v25 }
 0x5d4   : > { %1689 = vmatprep.subr.bf16.mxu1 %v1894_v4 }
 0x5d7   : > { %1690 = vmatpush3.bf16.msra.mxu1 %v1787_v26 }
 0x5d8   : > { %1691 = vmatprep.subr.bf16.mxu1 %v1894_v4 }
 0x5db   : > { %1692 = vmatpush3.bf16.msra.mxu1 %v1788_v27 }
 0x691   : > { %v1167_v57 = vpop.f32.mrb[16].mxu1 }
 0x692   : > { %v1173_v58 = vadd.f32 %v1167_v57, %v2013_v1  ;;  %v1667_v59 = vpop.f32.mrb[17].mxu1  ;;  %v1779_v1 = vld [vmem:[%s2274_s6] sm:$0xff]  }
 0x693   : > { %v1170_v60 = vpop.f32.mrb[18].mxu1  ;;  %1670 = vmatpush3.bf16.msra.mxu0 %v1779_v1 }
 0x694   : > { %v1178_v61 = vadd.f32 %v1524_v56, %v1173_v58  ;;  %v1668_v62 = vpop.f32.mrb[19].mxu1  ;;  %1671 = vmatprep.subr.bf16.mxu0 %v1894_v4 }
 0x696   : > { %1179 = vst.msk [vmem:[#allocation6] sm:$0xff] %vm327_vm0, %v1178_v61 }
 0x697   : > { %1672 = vmatpush3.bf16.msra.mxu0 %v1780_v8 }
 0x69d   : > { %v2156_v63 = vld [vmem:[#allocation6] sm:$0xff] }
 0x69e   : > { %v1181_v0 = vsel %vm327_vm0, %v2156_v63, 0.0 }
 0x69f   : > { %1182 = vadd.xlane.f32.xlu1 %v1181_v0 }
 0x72c   : > { %v1183_v2 = vpop.xlane.xlu1 %1182 }
 0x72d   : > { %v1184_v3 = vmul.f32 0.03125, %v1183_v2 }
 0x72f   : > { %v1185_v5 = vsub.f32 %v2156_v63, %v1184_v3 }
 0x731   : > { %v1186_v6 = vmul.f32 %v1185_v5, %v1185_v5 }
 0x733   : > { %v1187_v7 = vsel %vm327_vm0, %v1186_v6, 0.0 }
 0x734   : > { %1188 = vadd.xlane.f32.xlu0 %v1187_v7 }
 0x7c1   : > { %v1189_v9 = vpop.xlane.xlu0 %1188 }
 0x7c2   : > { %v1190_v10 = vmul.f32 0.03125, %v1189_v9 }
 0x7c4   : > { %v1191_v11 = vadd.f32 1e-05, %v1190_v10 }
 0x7c6   : > { %1809 = vrsqrt.f32 %v1191_v11 }
 0x7d0   : > { %v1810_v12 = vpop.eup %1809 }
 0x7d1   : > { %v1193_v14 = vmul.f32 %v1810_v12, %v1185_v5 }
 0x7d3   : > { %v1198_v16 = vmul.f32 %v1525_v13, %v1193_v14 }
 0x7d5   : > { %v1203_v17 = vadd.f32 %v1526_v15, %v1198_v16 }
 0x7d7   : > { %v1204_v18 = vpack.c.bf16 %v1203_v17, %v1203_v17 }
 0x7d9   : > { %1205 = vst.msk [vmem:[#allocation5] sm:$0xf] %vm426_vm2, %v1204_v18 }
 0x7e0   : > { %v1206_v19 = vld [vmem:[#allocation5] sm:$0xf] }
 0x7e1   : > { %1674 = vmatmul.mubr.msk.bf16.vlgmr.msra.gmra.mrb[28].mxu0 %vm327_vm0, %v1206_v19 }
 0x8b4   : > { %v1267_v29 = vpop.f32.mrb[28].mxu0 }
 0x8b5   : > { %v1268_v30 = vadd.f32 %v1527_v28, %v1267_v29  ;;  %v1675_v31 = vpop.f32.mrb[29].mxu0 }
 0x8b6   : > { %v1270_v32 = vpop.f32.mrb[30].mxu0 }
 0x8b7   : > { %v1274_v33 = vmul.f32 0.044715, %v1268_v30  ;;  %v1676_v34 = vpop.f32.mrb[31].mxu0  ;;  %v1273_v4 = vmul.f32 0.5, %v1268_v30 }
 0x8b9   : > { %v1275_v35 = vmul.f32 %v1274_v33, %v1268_v30 }
 0x8bb   : > { %v1276_v36 = vmul.f32 %v1275_v35, %v1268_v30 }
 0x8bd   : > { %v1277_v37 = vadd.f32 %v1276_v36, %v1268_v30 }
 0x8bf   : > { %v1278_v38 = vmul.f32 0.7978846, %v1277_v37 }
 0x8c1   : > { %1811 = vtanh.f32 %v1278_v38 }
 0x8cb   : > { %v1812_v39 = vpop.eup %1811 }
 0x8cc   : > { %v1280_v40 = vadd.f32 1.0, %v1812_v39 }
 0x8ce   : > { %v1281_v41 = vmul.f32 %v1280_v40, %v1273_v4 }
 0x8d0   : > { %v1282_v42 = vpack.c.bf16 %v1281_v41, %v1281_v41 }
 0x8d2   : > { %1283 = vst [vmem:[#allocation7] sm:$0xf] %v1282_v42 }
 0x8d9   : > { %v1284_v43 = vld [vmem:[#allocation7] sm:$0xf] }
 0x8da   : > { %1694 = vmatmul.mubr.bf16.vlgmr.msra.gmra.mrb[20].mxu1 %v1284_v43 }
 0x9ad   : > { %v1383_v45 = vpop.f32.mrb[20].mxu1 }
 0x9ae   : > { %v1390_v46 = vadd.f32 %v1383_v45, %v2156_v63  ;;  %v1695_v47 = vpop.f32.mrb[21].mxu1 }
 0x9af   : > { %v1386_v48 = vpop.f32.mrb[22].mxu1 }
 0x9b0   : > { %v1395_v49 = vadd.f32 %v1539_v44, %v1390_v46  ;;  %v1696_v50 = vpop.f32.mrb[23].mxu1 }
 0x9b2   : > { %1396 = vst.msk [vmem:[%s310_s12] sm:$0xff] %vm327_vm0, %v1395_v49 }
 0x9b3   : > { %1826 = shalt.err (!%p1823_p5)
}
 0x9b4   : > { %s1827_s24 = scalar_lea.hbm %s2220_s20, 128  ;;  %s1831_s12 = scalar_lea.hbm %s2276_s8, 256 }
 0x9b5   : > { %p1828_p6 = scmp.ne.s32.totalorder %s2220_s20, %s1827_s24  ;;  %p1832_p10 = scmp.lt.u32.totalorder %s2220_s20, %s2276_s8 }
 0x9b6   : > { %p1833_p11 = scmp.lt.u32.totalorder %s1831_s12, %s1827_s24  ;;  %p1835_p13 = scmp.lt.u32.totalorder %s1827_s24, %s2220_s20 }
 0x9b7   : > { %p1829_p7 = pnand %p1828_p6, %p1989_p4 }
 0x9b8   : > { %p1834_p12 = por %p1833_p11, %p1832_p10 }
 0x9b9   : > { %p1830_p9 = pneg %p1829_p7 }
 0x9ba   : > { %p1836_p0 = por %p1835_p13, %p1834_p12 }
 0x9bc   : > { %p1837_p1 = pnand %p1836_p0, %p1830_p9 }
 0x9be   : > { %1840 = shalt.err (!%p1837_p1)
}
 0x9bf   : > { %1697 = dma.vmem_to_hbm [thread:$0]  (%p1989_p4), %s2222_s23, 128, %s2220_s20, %s1398_s30  }
 0x9c0 PF: > { %p1703_p2 = scmp.ge.s32.totalorder %s1891_s10, 2  ;;  %s1424_s21 = sand.u32 1, %s1871_s27  }
 0x9c1   : > { %s1425_s22 = scalar_lea.sflag [#allocation9], %s1424_s21 }
 0x9c2   : > { %p1700_p3 = pnand %p1703_p2, %p1996_p8 }
 0x9c4   : > { %1866 = dma.done.wait (!%p1700_p3), %s1425_s22, 128  }
 0x9c5   : > { %1868 = vsyncadd (!%p1700_p3), %s1425_s22, 4294967168  ;;  %s21_s10 = sadd.s32 1, %s1891_s10   ;;  %s2279_s27 = smov %s1875_s28 }
 0x9c6   : > { %p18_p5 = scmp.ge.s32.totalorder %s21_s10, 4   ;;  %s2280_s28 = smov %s1879_s29 }
 0x9c7   : > { %s2281_s29 = smov %s2002_s18  ;;  %s2282_s30 = smov %s1887_s9 }
 0x9c8   : > { %s2283_s9 = smov %s2285_s13  ;;  %20 = sbr.rel (!%p18_p5) target bundleno = 4 (0x4), region = 92 }
 0x9cf   :  { %1430 = vsyncpa [#allocation9], 1 }
 0x9d0   :  { %1432 = vsyncpa [#allocation9 + $0x1], 1 }

// kernel: tpu_custom_call.1
= control target key start
LH: loop header
LB: loop body
LE: loop exit
PB: predicated region body
PF: predicated region fallthrough
CT: control target
= control target key end

     0   :  { %13 = vsyncpa [#allocation9], 0  ;;  %s2268_s0 = inlined_call_operand.vmem [shape: f32[2,8,32], index: 0, kind: input, shape index: {}]   ;;  %s2269_s1 = inlined_call_operand.vmem [shape: f32[6,32], index: 1, kind: input, shape index: {}]   ;;  %s2270_s2 = inlined_call_operand.vmem [shape: f32[1,96], index: 2, kind: input, shape index: {}]   ;;  %s2271_s3 = inlined_call_operand.vmem [shape: f32[1,128], index: 3, kind: input, shape index: {}]   ;;  %s2272_s4 = inlined_call_operand.vmem [shape: bf16[32,96], index: 4, kind: input, shape index: {}]   ;;  %s2273_s5 = inlined_call_operand.vmem [shape: bf16[32,32], index: 5, kind: input, shape index: {}]   ;;  %s2274_s6 = inlined_call_operand.vmem [shape: bf16[32,128], index: 6, kind: input, shape index: {}]   ;;  %s2275_s7 = inlined_call_operand.vmem [shape: bf16[128,32], index: 7, kind: input, shape index: {}]   ;;  %s2276_s8 = inlined_call_operand.hbm [shape: f32[2,8,32], index: 8, kind: output, shape index: {}]  }
   0x1   :  { %15 = vsyncpa [#allocation9 + $0x1], 0  ;;  %s1949_s27 = smov 0   ;;  %s1951_s28 = smov 0  }
   0x2   :  { %s1953_s29 = smov 0   ;;  %s1955_s30 = smov 0  }
   0x3   :  { %s1957_s9 = smov 0   ;;  %s1959_s10 = smov 0  }
   0x4 LB: > { %s1482_s11 = sadd.s32 4294967295, %s1891_s10   ;;  %s1483_s12 = sadd.s32 4294967294, %s1891_s10   ;;  %s1891_s10 = sphi %s1959_s10, %s21_s10   ;;  %s1887_s9 = sphi %s1957_s9, %s2283_s9   ;;  %s1883_s30 = sphi %s1955_s30, %s2282_s30   ;;  %s1879_s29 = sphi %s1953_s29, %s2281_s29   ;;  %s1875_s28 = sphi %s1951_s28, %s2280_s28   ;;  %s1871_s27 = sphi %s1949_s27, %s2279_s27  }
   0x5   : > { %s33_s13 = sadd.s32 1, %s1887_s9  ;;  %s215_s14 = sadd.s32 1, %s1879_s29 }
   0x6   : > { %p35_p0 = scmp.ge.s32.totalorder %s33_s13, 2  ;;  %p225_p1 = scmp.ne.s32.totalorder %s1879_s29, %s1875_s28 }
   0x7   : > { %p226_p2 = scmp.eq.s32.totalorder %s1482_s11, 1  ;;  %p231_p3 = scmp.ne.s32.totalorder %s1875_s28, %s1871_s27 }
   0x8   : > { %s2285_s13 = smov (%p35_p0, %s33_s13), 0  ;;  %p232_p5 = scmp.eq.s32.totalorder %s1483_s12, 1 }
   0x9   : > { %p1989_p4 = por %p226_p2, %p225_p1  ;;  %s210_s16 = ssub.s32 %s1887_s9, %s2285_s13 }
   0xa   : > { %p1486_p6 = scmp.ge.s32.totalorder %s1891_s10, 1  ;;  %p213_p7 = scmp.eq.s32.totalorder %s210_s16, 0 }
   0xb   : > { %p1996_p8 = por %p232_p5, %p231_p3  ;;  %p278_p9 = scmp.lt.s32.totalorder %s1891_s10, 3 }
   0xc   : > { %s2002_s18 = scalar_select %p213_p7, %s1879_s29, %s215_s14  }
   0xd   : > { %p279_p10 = pnand %p1486_p6, %p278_p9 }
   0xe   : > { %p311_p11 = scmp.lt.s32.totalorder (!%p279_p10), %s1883_s30, 1  ;;  %v1763_v0 = vld [vmem:[%s2272_s4 + $0x8] sm:$0xff] (!%p279_p10)   ;;  %vm327_vm0 = vcmask (!%p279_p10), 261120   ;;  %s1893_s23 = smov (!%p279_p10), 96   ;;  %v1762_v3 = vld [vmem:[%s2272_s4] sm:$0xff] (!%p279_p10)   ;;  %v1894_v4 = vmov (!%p279_p10), 0.0  }
   0xf   : > { %282 = sbr.rel (%p279_p10) target bundleno = 2496 (0x9c0), region = 52  ;;  %375 = vrot.lane.b32.xlu1 (!%p279_p10), %v1763_v0, %s1893_s23  ;;  %1589 = vmatprep.subr.bf16.mxu0 (!%p279_p10), %v1894_v4  ;;  %v1764_v13 = vld [vmem:[%s2272_s4] sm:$0xff] (!%p279_p10)   ;;  %vm1896_vm1 = vmmov (!%p279_p10), 0   ;;  %v1765_v18 = vld [vmem:[%s2272_s4 + $0x8] sm:$0xff] (!%p279_p10)   ;;  %vm426_vm2 = vcmask (!%p279_p10), 257024   ;;  %vm607_vm3 = vcmask (!%p279_p10), 64512  }
  0x10   : > { %1613 = vmatprep.subr.bf16.mxu1 (!%p279_p10), %v1894_v4  ;;  %1593 = vmatprep.mubr.msk.bf16.mxu0 (!%p279_p10), %vm1896_vm1, %v1894_v4  ;;  %v2044_v19 = vld [vmem:[%s2270_s2] ss:$0 sm:$0xff] (!%p279_p10)  ;;  %v1548_v26 = vld [vmem:[%s2269_s1 + $0x1] ss:$0 sm:$0xff] (!%p279_p10)  ;;  %v1767_v36 = vld [vmem:[%s2272_s4 + $0x8] sm:$0xff] (!%p279_p10)   ;;  %s1897_s21 = smov (!%p279_p10), 120  }
  0x11   : > { %1615 = vmatprep.mubr.msk.bf16.mxu1 (!%p279_p10), %vm1896_vm1, %v1894_v4  ;;  %v1547_v24 = vld [vmem:[%s2269_s1] ss:$0 sm:$0xff] (!%p279_p10)  ;;  %s1899_s24 = smov (!%p279_p10), 104   ;;  %vm668_vm4 = vcmask (!%p279_p10), 1043456   ;;  %vm715_vm6 = vcmask (!%p279_p10), 60416   ;;  %s1902_s14 = smov (!%p279_p10), 24  }
  0x12   : > { %v1766_v35 = vld [vmem:[%s2272_s4] sm:$0xff] (!%p279_p10)   ;;  %vm847_vm7 = vcmask (!%p279_p10), 126016   ;;  %vm979_vm8 = vcmask (!%p279_p10), 191616   ;;  %vm1111_vm9 = vcmask (!%p279_p10), 257216   ;;  %s1541_s11 = sshll.u32 (!%p279_p10), %s1883_s30, 7 }
  0x13   : > { %s2220_s20 = scalar_lea.hbm (!%p279_p10), %s2276_s8, %s1541_s11 }
  0x16   : > { %s312_s19 = scalar_select %p311_p11, %s1883_s30, 1 }
  0x18   : > { %s1488_s22 = sshll.u32 %s312_s19, 3  ;;  %s1895_s19 = smov 64  }
  0x19   : > { %s314_s26 = scalar_lea.vmem %s2268_s0, %s1488_s22  ;;  %s1898_s22 = smov 112  }
  0x1a   : > { %v2013_v1 = vld [vmem:[%s314_s26] sm:$0xff] }
  0x1b   : > { %v328_v2 = vsel %vm327_vm0, %v2013_v1, 0.0 }
  0x1c   : > { %329 = vadd.xlane.f32.xlu0 %v328_v2 }
  0x20   : > { %504 = vadd.xlane.f32.xlu0 %v328_v2 }
  0x36   : > { %373 = vrot.lane.b32.xlu0 %v1762_v3, %s1893_s23 }
  0x3a   : > { %379 = vrot.lane.b32.xlu0 %v2044_v19, %s1893_s23  ;;  %s1901_s23 = smov 16  }
  0x81   : > { %v376_v12 = vpop.permute.xlu1 %375 }
  0xa9   : > { %v330_v5 = vpop.xlane.xlu0 %329 }
  0xaa   : > { %v332_v6 = vmul.f32 0.03125, %v330_v5 }
  0xac   : > { %v333_v7 = vsub.f32 %v2013_v1, %v332_v6 }
  0xad   : > { %v505_v8 = vpop.xlane.xlu0 %504 }
  0xae   : > { %v334_v9 = vmul.f32 %v333_v7, %v333_v7  ;;  %v507_v14 = vmul.f32 0.03125, %v505_v8 }
  0xb0   : > { %v335_v10 = vsel %vm327_vm0, %v334_v9, 0.0  ;;  %v508_v15 = vsub.f32 %v2013_v1, %v507_v14 }
  0xb1   : > { %336 = vadd.xlane.f32.xlu1 %v335_v10  ;;  %v374_v11 = vpop.permute.xlu0 %373 }
  0xb2   : > { %1590 = vmatpush3.bf16.msra.mxu0 %v374_v11  ;;  %v509_v16 = vmul.f32 %v508_v15, %v508_v15 }
  0xb3   : > { %1591 = vmatprep.subr.bf16.mxu0 %v1894_v4 }
  0xb4   : > { %v510_v17 = vsel %vm327_vm0, %v509_v16, 0.0 }
  0xb5   : > { %v380_v42 = vpop.permute.xlu0 %379 }
  0xb6   : > { %1592 = vmatpush3.bf16.msra.mxu0 %v376_v12 }
  0xb7   : > { %1597 = vmatprep.subr.bf16.mxu0 %v1894_v4 }
  0xc2   : > { %448 = vrot.lane.b32.xlu1 %v1764_v13, %s1895_s19 }
  0xe6   : > { %511 = vadd.xlane.f32.xlu1 %v510_v17 }
  0xf7   : > { %450 = vrot.lane.b32.xlu1 %v1765_v18, %s1895_s19 }
 0x13e   : > { %v337_v20 = vpop.xlane.xlu1 %336 }
 0x13f   : > { %v338_v21 = vmul.f32 0.03125, %v337_v20  ;;  %v342_v20 = vlaneseq }
 0x141   : > { %v339_v22 = vadd.f32 1e-05, %v338_v21  ;;  %v343_v21 = vshrl.u32 %v342_v20, 7 }
 0x142   : > { %v449_v30 = vpop.permute.xlu1 %448 }
 0x143   : > { %1789 = vrsqrt.f32 %v339_v22  ;;  %v602_v22 = vand.u32 127, %v342_v20 }
 0x145   : > { %vm603_vm5 = vcmp.le.s32.totalorder %v602_v22, %v343_v21 }
 0x14d   : > { %v1790_v23 = vpop.eup %1789 }
 0x14e   : > { %v341_v25 = vmul.f32 %v1790_v23, %v333_v7 }
 0x150   : > { %v346_v27 = vmul.f32 %v1547_v24, %v341_v25 }
 0x152   : > { %v351_v28 = vadd.f32 %v1548_v26, %v346_v27 }
 0x154   : > { %v352_v29 = vpack.c.bf16 %v351_v28, %v351_v28 }
 0x156   : > { %1594 = vmatmul.mubr.msk.bf16.vlgmr.msra.gmra.mrb[0].mxu0 %vm327_vm0, %v352_v29 }
 0x157   : > { %1598 = vmatpush3.bf16.msra.mxu0 %v449_v30  ;;  %1601 = vmatprep.mubr.msk.bf16.mxu0 %vm1896_vm1, %v1894_v4 }
 0x158   : > { %1599 = vmatprep.subr.bf16.mxu0 %v1894_v4 }
 0x173   : > { %v512_v31 = vpop.xlane.xlu1 %511 }
 0x174   : > { %v513_v32 = vmul.f32 0.03125, %v512_v31 }
 0x176   : > { %v514_v33 = vadd.f32 1e-05, %v513_v32 }
 0x177   : > { %v451_v34 = vpop.permute.xlu1 %450 }
 0x178   : > { %1791 = vrsqrt.f32 %v514_v33  ;;  %1600 = vmatpush3.bf16.msra.mxu0 %v451_v34 }
 0x179   : > { %1605 = vmatprep.subr.bf16.mxu0 %v1894_v4 }
 0x17b   : > { %1602 = vmatmul.mubr.msk.bf16.vlgmr.msra.gmra.mrb[4].mxu0 %vm327_vm0, %v352_v29 }
 0x17c   : > { %1606 = vmatpush3.bf16.msra.mxu0 %v1766_v35  ;;  %1609 = vmatprep.mubr.msk.bf16.mxu0 %vm1896_vm1, %v1894_v4 }
 0x17d   : > { %1607 = vmatprep.subr.bf16.mxu0 %v1894_v4 }
 0x180   : > { %1608 = vmatpush3.bf16.msra.mxu0 %v1767_v36 }
 0x181   : > { %1619 = vmatprep.subr.bf16.mxu0 %v1894_v4 }
 0x182   : > { %v1792_v37 = vpop.eup %1791 }
 0x183   : > { %v516_v38 = vmul.f32 %v1792_v37, %v508_v15 }
 0x185   : > { %v521_v39 = vmul.f32 %v1547_v24, %v516_v38 }
 0x187   : > { %v526_v40 = vadd.f32 %v1548_v26, %v521_v39 }
 0x189   : > { %v527_v41 = vpack.c.bf16 %v526_v40, %v526_v40 }
 0x18b   : > { %1610 = vmatmul.mubr.msk.bf16.vlgmr.msra.gmra.mrb[8].mxu0 %vm327_vm0, %v527_v41 }
 0x18c   : > { %1621 = vmatprep.mubr.msk.bf16.mxu0 %vm1896_vm1, %v1894_v4 }
 0x229   : > { %v419_v43 = vpop.f32.mrb[0].mxu0 }
 0x22a   : > { %v420_v44 = vadd.f32 %v419_v43, %v380_v42  ;;  %v1595_v45 = vpop.f32.mrb[1].mxu0 }
 0x22b   : > { %v422_v46 = vpop.f32.mrb[2].mxu0 }
 0x22c   : > { %v425_v47 = vpack.c.bf16 %v420_v44, %v420_v44  ;;  %v1596_v48 = vpop.f32.mrb[3].mxu0 }
 0x22e   : > { %427 = vst.msk [vmem:[#allocation2] sm:$0xf] %vm426_vm2, %v425_v47 }
 0x235   : > { %v605_v49 = vld [vmem:[#allocation2] sm:$0xf] }
 0x236   : > { %v1768_v50 = vld [vmem:[#allocation2] ss:$0 sps:$4 sm:$0xff]   ;;  %v612_v51 = vsel %vm607_vm3, %v605_v49, 0 }
 0x237   : > { %1614 = vmatpush3.bf16.xpose.msra.mxu1 %v612_v51  ;;  %728 = vrot.lane.b32.xlu1 %v1768_v50, %s1897_s21  ;;  %v1769_v52 = vld [vmem:[#allocation2] ss:$0 sps:$4 sm:$0xff]  }
 0x238   : > { %1625 = vmatprep.subr.bf16.mxu1 %v1894_v4  ;;  %v1770_v53 = vld [vmem:[#allocation2] ss:$0 sps:$4 sm:$0xff]  }
 0x23b   : > { %860 = vrot.lane.b32.xlu1 %v1769_v52, %s1898_s22 }
 0x23f   : > { %992 = vrot.lane.b32.xlu1 %v1770_v53, %s1899_s24 }
 0x243   : > { %454 = vrot.lane.b32.xlu1 %v2044_v19, %s1895_s19  ;;  %s1900_s19 = smov 8  }
 0x24e   : > { %v491_v54 = vpop.f32.mrb[4].mxu0 }
 0x24f   : > { %v1603_v55 = vpop.f32.mrb[5].mxu0 }
 0x250   : > { %v494_v56 = vpop.f32.mrb[6].mxu0 }
 0x251   : > { %v1604_v57 = vpop.f32.mrb[7].mxu0 }
 0x25e   : > { %v588_v58 = vpop.f32.mrb[8].mxu0 }
 0x25f   : > { %v589_v59 = vadd.f32 %v2044_v19, %v588_v58  ;;  %v1611_v60 = vpop.f32.mrb[9].mxu0 }
 0x260   : > { %v591_v61 = vpop.f32.mrb[10].mxu0 }
 0x261   : > { %v594_v62 = vpack.c.bf16 %v589_v59, %v589_v59  ;;  %v1612_v63 = vpop.f32.mrb[11].mxu0 }
 0x263   : > { %596 = vst.msk [vmem:[#allocation4] sm:$0xf] %vm426_vm2, %v594_v62 }
 0x26a   : > { %v604_v0 = vld [vmem:[#allocation4] sm:$0xf] }
 0x26b   : > { %v1771_v2 = vld [vmem:[#allocation4] ss:$0 sps:$4 sm:$0xff]   ;;  %1616 = vmatmul.mubr.msk.bf16.vlgmr.msra.gmra.mrb[0].mxu1 %vm607_vm3, %v604_v0 }
 0x26c   : > { %723 = vrot.lane.b32.xlu0 %v1771_v2, %s1897_s21  ;;  %1627 = vmatprep.mubr.msk.bf16.mxu1 %vm1896_vm1, %v1894_v4  ;;  %v1772_v3 = vld [vmem:[#allocation4] ss:$0 sps:$4 sm:$0xff]  }
 0x26d   : > { %v1773_v5 = vld [vmem:[#allocation4] ss:$0 sps:$4 sm:$0xff]  }
 0x270   : > { %855 = vrot.lane.b32.xlu0 %v1772_v3, %s1898_s22 }
 0x274   : > { %987 = vrot.lane.b32.xlu0 %v1773_v5, %s1899_s24 }
 0x2a9   : > { %v729_v6 = vpop.permute.xlu1 %728 }
 0x2aa   : > { %v734_v7 = vsel %vm607_vm3, %v729_v6, 0 }
 0x2ab   : > { %1626 = vmatpush3.bf16.xpose.msra.mxu1 %v734_v7 }
 0x2ac   : > { %1637 = vmatprep.subr.bf16.mxu1 %v1894_v4 }
 0x2ad   : > { %v861_v8 = vpop.permute.xlu1 %860 }
 0x2ae   : > { %v866_v16 = vsel %vm607_vm3, %v861_v8, 0 }
 0x2b1   : > { %v993_v9 = vpop.permute.xlu1 %992 }
 0x2b2   : > { %v998_v18 = vsel %vm607_vm3, %v993_v9, 0 }
 0x2b5   : > { %v455_v10 = vpop.permute.xlu1 %454 }
 0x2b6   : > { %v492_v11 = vadd.f32 %v491_v54, %v455_v10 }
 0x2b8   : > { %v497_v12 = vpack.c.bf16 %v492_v11, %v492_v11 }
 0x2ba   : > { %498 = vst.msk [vmem:[#allocation3] sm:$0xf] %vm426_vm2, %v497_v12 }
 0x2c1   : > { %v606_v13 = vld [vmem:[#allocation3] sm:$0xf] }
 0x2c2   : > { %v670_v14 = vsel %vm668_vm4, %v606_v13, 0  ;;  %v1774_v46 = vld [vmem:[#allocation3] ss:$0 sps:$4 sm:$0xff]  }
 0x2c3   : > { %1620 = vmatpush3.bf16.msra.mxu0 %v670_v14  ;;  %v1775_v48 = vld [vmem:[#allocation3] ss:$0 sps:$4 sm:$0xff]  }
 0x2c4   : > { %1631 = vmatprep.subr.bf16.mxu0 %v1894_v4  ;;  %v1776_v52 = vld [vmem:[#allocation3] ss:$0 sps:$4 sm:$0xff]  }
 0x2de   : > { %v724_v15 = vpop.permute.xlu0 %723 }
 0x2df   : > { %1628 = vmatmul.mubr.msk.bf16.vlgmr.msra.gmra.mrb[4].mxu1 %vm607_vm3, %v724_v15 }
 0x2e0   : > { %1638 = vmatpush3.bf16.xpose.msra.mxu1 %v866_v16  ;;  %1639 = vmatprep.mubr.msk.bf16.mxu1 %vm1896_vm1, %v1894_v4 }
 0x2e1   : > { %1649 = vmatprep.subr.bf16.mxu1 %v1894_v4 }
 0x2e2   : > { %v856_v17 = vpop.permute.xlu0 %855 }
 0x2e6   : > { %v988_v19 = vpop.permute.xlu0 %987 }
 0x2e7   : > { %1640 = vmatmul.mubr.msk.bf16.vlgmr.msra.gmra.mrb[8].mxu1 %vm607_vm3, %v856_v17 }
 0x2e8   : > { %1650 = vmatpush3.bf16.xpose.msra.mxu1 %v998_v18  ;;  %1651 = vmatprep.mubr.msk.bf16.mxu1 %vm1896_vm1, %v1894_v4 }
 0x2e9   : > { %1661 = vmatprep.subr.bf16.mxu1 %v1894_v4 }
 0x2ef   : > { %1652 = vmatmul.mubr.msk.bf16.vlgmr.msra.gmra.mrb[12].mxu1 %vm607_vm3, %v988_v19 }
 0x2f0   : > { %1665 = vmatprep.mubr.msk.bf16.mxu1 %vm1896_vm1, %v1894_v4 }
 0x33e   : > { %v648_v23 = vpop.f32.mrb[0].mxu1 }
 0x33f   : > { %v654_v24 = vsel %vm603_vm5, %v648_v23, -1e+30  ;;  %v1617_v25 = vpop.f32.mrb[1].mxu1 }
 0x340   : > { %v651_v26 = vpop.f32.mrb[2].mxu1  ;;  %v655_v27 = vsel %vm607_vm3, %v654_v24, -inf }
 0x341   : > { %656 = vmax.xlane.f32.xlu0 %v655_v27  ;;  %v1618_v28 = vpop.f32.mrb[3].mxu1 }
 0x3b2   : > { %v770_v29 = vpop.f32.mrb[4].mxu1 }
 0x3b3   : > { %v776_v30 = vsel %vm603_vm5, %v770_v29, -1e+30  ;;  %v1629_v31 = vpop.f32.mrb[5].mxu1 }
 0x3b4   : > { %v773_v32 = vpop.f32.mrb[6].mxu1  ;;  %v777_v33 = vsel %vm607_vm3, %v776_v30, -inf }
 0x3b5   : > { %778 = vmax.xlane.f32.xlu1 %v777_v33  ;;  %v1630_v34 = vpop.f32.mrb[7].mxu1 }
 0x3ba   : > { %v902_v35 = vpop.f32.mrb[8].mxu1 }
 0x3bb   : > { %v908_v36 = vsel %vm603_vm5, %v902_v35, -1e+30  ;;  %v1641_v37 = vpop.f32.mrb[9].mxu1 }
 0x3bc   : > { %v905_v38 = vpop.f32.mrb[10].mxu1  ;;  %v909_v39 = vsel %vm607_vm3, %v908_v36, -inf }
 0x3bd   : > { %910 = vmax.xlane.f32.xlu0 %v909_v39  ;;  %v1642_v40 = vpop.f32.mrb[11].mxu1  ;;  %v1777_v38 = vld [vmem:[%s2273_s5] sm:$0xff]  }
 0x3be   : > { %1662 = vmatpush3.bf16.msra.mxu1 %v1777_v38 }
 0x3bf   : > { %1663 = vmatprep.subr.bf16.mxu1 %v1894_v4 }
 0x3c2   : > { %v1034_v41 = vpop.f32.mrb[12].mxu1 }
 0x3c3   : > { %v1040_v42 = vsel %vm603_vm5, %v1034_v41, -1e+30  ;;  %v1653_v43 = vpop.f32.mrb[13].mxu1 }
 0x3c4   : > { %v1037_v44 = vpop.f32.mrb[14].mxu1  ;;  %v1041_v45 = vsel %vm607_vm3, %v1040_v42, -inf }
 0x3c5   : > { %1042 = vmax.xlane.f32.xlu0 %v1041_v45  ;;  %v1654_v47 = vpop.f32.mrb[15].mxu1 }
 0x3c6   : > { %922 = vrot.lane.b32.xlu1 %v1774_v46, %s1898_s22  ;;  %s1903_s22 = smov [#allocation8]  }
 0x3ca   : > { %1054 = vrot.lane.b32.xlu1 %v1775_v48, %s1899_s24  ;;  %s308_s24 = sand.u32 1, %s1875_s28  }
 0x3cb   : > { %s1398_s30 = scalar_lea.sflag [#allocation9], %s308_s24 }
 0x3ce   : > { %v657_v49 = vpop.xlane.xlu0 %656 }
 0x3cf   : > { %v658_v50 = vsub.f32 %v654_v24, %v657_v49 }
 0x3d1   : > { %v659_v51 = vmul.f32 1.442695, %v658_v50 }
 0x3d3   : > { %1793 = vpow2.f32 %v659_v51 }
 0x3db   : > { %790 = vrot.lane.b32.xlu0 %v1776_v52, %s1897_s21 }
 0x3dd   : > { %v1794_v53 = vpop.eup %1793 }
 0x3de   : > { %v664_v54 = vpack.c.bf16 %v1794_v53, %v1794_v53  ;;  %v661_v16 = vsel %vm607_vm3, %v1794_v53, 0.0 }
 0x3e0   : > { %1622 = vmatmul.mubr.msk.bf16.vlgmr.msra.gmra.mrb[12].mxu0 %vm607_vm3, %v664_v54 }
 0x3e1   : > { %1633 = vmatprep.mubr.msk.bf16.mxu0 %vm1896_vm1, %v1894_v4 }
 0x442   : > { %v779_v55 = vpop.xlane.xlu1 %778 }
 0x443   : > { %v780_v56 = vsub.f32 %v776_v30, %v779_v55 }
 0x445   : > { %v781_v57 = vmul.f32 1.442695, %v780_v56  ;;  %v1524_v56 = vld [vmem:[%s2269_s1 + $0x4] ss:$0 sm:$0xff] }
 0x446   : > { %v923_v6 = vpop.permute.xlu1 %922 }
 0x447   : > { %1795 = vpow2.f32 %v781_v57  ;;  %v928_v10 = vsel %vm668_vm4, %v923_v6, 0 }
 0x44a   : > { %v911_v58 = vpop.xlane.xlu0 %910  ;;  %v1055_v11 = vpop.permute.xlu1 %1054 }
 0x44b   : > { %v912_v59 = vsub.f32 %v908_v36, %v911_v58  ;;  %v1060_v15 = vsel %vm668_vm4, %v1055_v11, 0 }
 0x44d   : > { %v913_v60 = vmul.f32 1.442695, %v912_v59 }
 0x44f   : > { %1797 = vpow2.f32 %v913_v60 }
 0x451   : > { %v1796_v61 = vpop.eup %1795 }
 0x452   : > { %v1043_v62 = vpop.xlane.xlu0 %1042  ;;  %v783_v63 = vsel %vm607_vm3, %v1796_v61, 0.0  ;;  %v786_v8 = vpack.c.bf16 %v1796_v61, %v1796_v61 }
 0x453   : > { %v1044_v0 = vsub.f32 %v1040_v42, %v1043_v62  ;;  %784 = vadd.xlane.f32.xlu1 %v783_v63  ;;  %v1778_v42 = vld [vmem:[%s2273_s5 + $0x8] sm:$0xff]  }
 0x454   : > { %1664 = vmatpush3.bf16.msra.mxu1 %v1778_v42 }
 0x455   : > { %v1045_v2 = vmul.f32 1.442695, %v1044_v0  ;;  %1677 = vmatprep.subr.bf16.mxu1 %v1894_v4 }
 0x456   : > { %v791_v3 = vpop.permute.xlu0 %790 }
 0x457   : > { %1799 = vpow2.f32 %v1045_v2  ;;  %v796_v5 = vsel %vm668_vm4, %v791_v3, 0 }
 0x458   : > { %1632 = vmatpush3.bf16.msra.mxu0 %v796_v5 }
 0x459   : > { %v1798_v7 = vpop.eup %1797  ;;  %1643 = vmatprep.subr.bf16.mxu0 %v1894_v4 }
 0x45a   : > { %v915_v9 = vsel %vm607_vm3, %v1798_v7, 0.0  ;;  %v918_v13 = vpack.c.bf16 %v1798_v7, %v1798_v7 }
 0x45b   : > { %916 = vadd.xlane.f32.xlu0 %v915_v9  ;;  %1634 = vmatmul.mubr.msk.bf16.vlgmr.msra.gmra.mrb[16].mxu0 %vm607_vm3, %v786_v8  ;;  %v1780_v8 = vld [vmem:[%s2274_s6 + $0x8] sm:$0xff]  }
 0x45c   : > { %1644 = vmatpush3.bf16.msra.mxu0 %v928_v10  ;;  %1645 = vmatprep.mubr.msk.bf16.mxu0 %vm1896_vm1, %v1894_v4 }
 0x45d   : > { %1655 = vmatprep.subr.bf16.mxu0 %v1894_v4 }
 0x461   : > { %v1800_v12 = vpop.eup %1799 }
 0x462   : > { %v1047_v14 = vsel %vm607_vm3, %v1800_v12, 0.0  ;;  %v1050_v17 = vpack.c.bf16 %v1800_v12, %v1800_v12 }
 0x463   : > { %1048 = vadd.xlane.f32.xlu0 %v1047_v14  ;;  %1646 = vmatmul.mubr.msk.bf16.vlgmr.msra.gmra.mrb[20].mxu0 %vm607_vm3, %v918_v13  ;;  %v1525_v13 = vld [vmem:[%s2269_s1 + $0x2] ss:$0 sm:$0xff] }
 0x464   : > { %1656 = vmatpush3.bf16.msra.mxu0 %v1060_v15  ;;  %1657 = vmatprep.mubr.msk.bf16.mxu0 %vm1896_vm1, %v1894_v4  ;;  %v1526_v15 = vld [vmem:[%s2269_s1 + $0x3] ss:$0 sm:$0xff] }
 0x465   : > { %1669 = vmatprep.subr.bf16.mxu0 %v1894_v4 }
 0x467   : > { %662 = vadd.xlane.f32.xlu0 %v661_v16 }
 0x46b   : > { %1658 = vmatmul.mubr.msk.bf16.vlgmr.msra.gmra.mrb[24].mxu0 %vm607_vm3, %v1050_v17 }
 0x46c   : > { %1673 = vmatprep.mubr.msk.bf16.mxu0 %vm1896_vm1, %v1894_v4 }
 0x4b3   : > { %v706_v18 = vpop.f32.mrb[12].mxu0 }
 0x4b4   : > { %v1623_v19 = vpop.f32.mrb[13].mxu0 }
 0x4b5   : > { %v709_v20 = vpop.f32.mrb[14].mxu0 }
 0x4b6   : > { %v1624_v21 = vpop.f32.mrb[15].mxu0  ;;  %v1781_v20 = vld [vmem:[%s2275_s7] sm:$0xff]  }
 0x4b7   : > { %v1782_v21 = vld [vmem:[%s2275_s7 + $0x8] sm:$0xff]  }
 0x4e0   : > { %v785_v28 = vpop.xlane.xlu1 %784 }
 0x4e8   : > { %v917_v22 = vpop.xlane.xlu0 %916 }
 0x4f0   : > { %v1049_v23 = vpop.xlane.xlu0 %1048 }
 0x4f4   : > { %v663_v24 = vpop.xlane.xlu0 %662 }
 0x4f5   : > { %1801 = vrcp.f32 %v663_v24  ;;  %v1785_v24 = vld [vmem:[%s2275_s7 + $0x20] sm:$0xff]  }
 0x4f6   : > { %1803 = vrcp.f32 %v785_v28  ;;  %v1527_v28 = vld [vmem:[%s2271_s3] ss:$0 sm:$0xff] }
 0x4f7   : > { %1805 = vrcp.f32 %v917_v22  ;;  %v1783_v22 = vld [vmem:[%s2275_s7 + $0x10] sm:$0xff]  }
 0x4f8   : > { %1807 = vrcp.f32 %v1049_v23  ;;  %v1784_v23 = vld [vmem:[%s2275_s7 + $0x18] sm:$0xff]  }
 0x4ff   : > { %v1802_v25 = vpop.eup %1801 }
 0x500   : > { %v713_v26 = vmul.f32 %v1802_v25, %v706_v18  ;;  %v1804_v29 = vpop.eup %1803  ;;  %v1786_v25 = vld [vmem:[%s2275_s7 + $0x28] sm:$0xff]  }
 0x501   : > { %v1806_v36 = vpop.eup %1805 }
 0x502   : > { %v714_v27 = vpack.c.bf16 %v713_v26, %v713_v26  ;;  %v1808_v45 = vpop.eup %1807  ;;  %v1787_v26 = vld [vmem:[%s2275_s7 + $0x30] sm:$0xff]  }
 0x504   : > { %716 = vst.msk [vmem:[#allocation5] sm:$0xf] %vm715_vm6, %v714_v27  ;;  %v1788_v27 = vld [vmem:[%s2275_s7 + $0x38] sm:$0xff]  }
 0x52e   : > { %v832_v30 = vpop.f32.mrb[16].mxu0 }
 0x52f   : > { %v839_v31 = vmul.f32 %v1804_v29, %v832_v30  ;;  %v1635_v32 = vpop.f32.mrb[17].mxu0 }
 0x530   : > { %v835_v33 = vpop.f32.mrb[18].mxu0 }
 0x531   : > { %v1544_v34 = vpack.c.bf16 %v839_v31, %v839_v31  ;;  %v1636_v35 = vpop.f32.mrb[19].mxu0 }
 0x533   : > { %844 = vrot.lane.b32.xlu1 %v1544_v34, %s1900_s19  ;;  %s1487_s19 = sshll.u32 %s308_s24, 3 }
 0x534   : > { %s310_s12 = scalar_lea.vmem [#allocation8], %s1487_s19  ;;  %s1817_s19 = sshll.u32 %s1903_s22, 4  ;;  %s1818_s19 = int_to_ptr.vmem [resolvable:$false] %s1817_s19 }
 0x535   : > { %s1819_s25 = scalar_lea.vmem %s1818_s19, 256 }
 0x536   : > { %v964_v37 = vpop.f32.mrb[20].mxu0 }
 0x537   : > { %v971_v39 = vmul.f32 %v1806_v36, %v964_v37  ;;  %v1647_v40 = vpop.f32.mrb[21].mxu0 }
 0x538   : > { %v967_v41 = vpop.f32.mrb[22].mxu0 }
 0x539   : > { %v1545_v43 = vpack.c.bf16 %v971_v39, %v971_v39  ;;  %v1648_v44 = vpop.f32.mrb[23].mxu0 }
 0x53a   : > { %v1539_v44 = vld [vmem:[%s2269_s1 + $0x5] ss:$0 sm:$0xff] }
 0x53b   : > { %976 = vrot.lane.b32.xlu0 %v1545_v43, %s1901_s23  ;;  %s1412_s23 = sshll.u32 %s310_s12, 4  ;;  %s2222_s23 = int_to_ptr.vmem [resolvable:$true] %s1412_s23 }
 0x53c   : > { %s1813_s21 = scalar_lea.vmem %s2222_s23, 128  ;;  %p1820_p1 = scmp.lt.s32.totalorder %s2222_s23, %s1818_s19 }
 0x53d   : > { %p1814_p12 = scmp.ne.s32.totalorder %s2222_s23, %s1813_s21  ;;  %p1821_p2 = scmp.lt.s32.totalorder %s1819_s25, %s1813_s21 }
 0x53e   : > { %v1096_v46 = vpop.f32.mrb[24].mxu0 }
 0x53f   : > { %v1103_v47 = vmul.f32 %v1808_v45, %v1096_v46  ;;  %v1659_v48 = vpop.f32.mrb[25].mxu0  ;;  %p1815_p13 = pnand %p1814_p12, %p1989_p4  ;;  %p1822_p3 = por %p1821_p2, %p1820_p1 }
 0x540   : > { %v1099_v49 = vpop.f32.mrb[26].mxu0 }
 0x541   : > { %v1546_v50 = vpack.c.bf16 %v1103_v47, %v1103_v47  ;;  %v1660_v51 = vpop.f32.mrb[27].mxu0  ;;  %p1816_p0 = pneg %p1815_p13 }
 0x543   : > { %1108 = vrot.lane.b32.xlu1 %v1546_v50, %s1902_s14  ;;  %p1823_p5 = pnand %p1822_p3, %p1816_p0 }
 0x5a5   : > { %v845_v52 = vpop.permute.xlu1 %844 }
 0x5a6   : > { %848 = vst.msk [vmem:[#allocation5] sm:$0xf] %vm847_vm7, %v845_v52 }
 0x5ad   : > { %v977_v53 = vpop.permute.xlu0 %976 }
 0x5ae   : > { %980 = vst.msk [vmem:[#allocation5] sm:$0xf] %vm979_vm8, %v977_v53 }
 0x5b5   : > { %v1109_v54 = vpop.permute.xlu1 %1108 }
 0x5b6   : > { %1112 = vst.msk [vmem:[#allocation5] sm:$0xf] %vm1111_vm9, %v1109_v54 }
 0x5bd   : > { %v1113_v55 = vld [vmem:[#allocation5] sm:$0xf] }
 0x5be   : > { %1666 = vmatmul.mubr.msk.bf16.vlgmr.msra.gmra.mrb[16].mxu1 %vm327_vm0, %v1113_v55 }
 0x5bf   : > { %1693 = vmatprep.mubr.msk.bf16.mxu1 %vm1896_vm1, %v1894_v4  ;;  %1678 = vmatpush3.bf16.msra.mxu1 %v1781_v20 }
 0x5c0   : > { %1679 = vmatprep.subr.bf16.mxu1 %v1894_v4 }
 0x5c3   : > { %1680 = vmatpush3.bf16.msra.mxu1 %v1782_v21 }
 0x5c4   : > { %1681 = vmatprep.subr.bf16.mxu1 %v1894_v4 }
 0x5c7   : > { %1682 = vmatpush3.bf16.msra.mxu1 %v1783_v22 }
 0x5c8   : > { %1683 = vmatprep.subr.bf16.mxu1 %v1894_v4 }
 0x5cb   : > { %1684 = vmatpush3.bf16.msra.mxu1 %v1784_v23 }
 0x5cc   : > { %1685 = vmatprep.subr.bf16.mxu1 %v1894_v4 }
 0x5cf   : > { %1686 = vmatpush3.bf16.msra.mxu1 %v1785_v24 }
 0x5d0   : > { %1687 = vmatprep.subr.bf16.mxu1 %v1894_v4 }
 0x5d3   : > { %1688 = vmatpush3.bf16.msra.mxu1 %v1786_v25 }
 0x5d4   : > { %1689 = vmatprep.subr.bf16.mxu1 %v1894_v4 }
 0x5d7   : > { %1690 = vmatpush3.bf16.msra.mxu1 %v1787_v26 }
 0x5d8   : > { %1691 = vmatprep.subr.bf16.mxu1 %v1894_v4 }
 0x5db   : > { %1692 = vmatpush3.bf16.msra.mxu1 %v1788_v27 }
 0x691   : > { %v1167_v57 = vpop.f32.mrb[16].mxu1 }
 0x692   : > { %v1173_v58 = vadd.f32 %v1167_v57, %v2013_v1  ;;  %v1667_v59 = vpop.f32.mrb[17].mxu1  ;;  %v1779_v1 = vld [vmem:[%s2274_s6] sm:$0xff]  }
 0x693   : > { %v1170_v60 = vpop.f32.mrb[18].mxu1  ;;  %1670 = vmatpush3.bf16.msra.mxu0 %v1779_v1 }
 0x694   : > { %v1178_v61 = vadd.f32 %v1524_v56, %v1173_v58  ;;  %v1668_v62 = vpop.f32.mrb[19].mxu1  ;;  %1671 = vmatprep.subr.bf16.mxu0 %v1894_v4 }
 0x696   : > { %1179 = vst.msk [vmem:[#allocation6] sm:$0xff] %vm327_vm0, %v1178_v61 }
 0x697   : > { %1672 = vmatpush3.bf16.msra.mxu0 %v1780_v8 }
 0x69d   : > { %v2156_v63 = vld [vmem:[#allocation6] sm:$0xff] }
 0x69e   : > { %v1181_v0 = vsel %vm327_vm0, %v2156_v63, 0.0 }
 0x69f   : > { %1182 = vadd.xlane.f32.xlu1 %v1181_v0 }
 0x72c   : > { %v1183_v2 = vpop.xlane.xlu1 %1182 }
 0x72d   : > { %v1184_v3 = vmul.f32 0.03125, %v1183_v2 }
 0x72f   : > { %v1185_v5 = vsub.f32 %v2156_v63, %v1184_v3 }
 0x731   : > { %v1186_v6 = vmul.f32 %v1185_v5, %v1185_v5 }
 0x733   : > { %v1187_v7 = vsel %vm327_vm0, %v1186_v6, 0.0 }
 0x734   : > { %1188 = vadd.xlane.f32.xlu0 %v1187_v7 }
 0x7c1   : > { %v1189_v9 = vpop.xlane.xlu0 %1188 }
 0x7c2   : > { %v1190_v10 = vmul.f32 0.03125, %v1189_v9 }
 0x7c4   : > { %v1191_v11 = vadd.f32 1e-05, %v1190_v10 }
 0x7c6   : > { %1809 = vrsqrt.f32 %v1191_v11 }
 0x7d0   : > { %v1810_v12 = vpop.eup %1809 }
 0x7d1   : > { %v1193_v14 = vmul.f32 %v1810_v12, %v1185_v5 }
 0x7d3   : > { %v1198_v16 = vmul.f32 %v1525_v13, %v1193_v14 }
 0x7d5   : > { %v1203_v17 = vadd.f32 %v1526_v15, %v1198_v16 }
 0x7d7   : > { %v1204_v18 = vpack.c.bf16 %v1203_v17, %v1203_v17 }
 0x7d9   : > { %1205 = vst.msk [vmem:[#allocation5] sm:$0xf] %vm426_vm2, %v1204_v18 }
 0x7e0   : > { %v1206_v19 = vld [vmem:[#allocation5] sm:$0xf] }
 0x7e1   : > { %1674 = vmatmul.mubr.msk.bf16.vlgmr.msra.gmra.mrb[28].mxu0 %vm327_vm0, %v1206_v19 }
 0x8b4   : > { %v1267_v29 = vpop.f32.mrb[28].mxu0 }
 0x8b5   : > { %v1268_v30 = vadd.f32 %v1527_v28, %v1267_v29  ;;  %v1675_v31 = vpop.f32.mrb[29].mxu0 }
 0x8b6   : > { %v1270_v32 = vpop.f32.mrb[30].mxu0 }
 0x8b7   : > { %v1274_v33 = vmul.f32 0.044715, %v1268_v30  ;;  %v1676_v34 = vpop.f32.mrb[31].mxu0  ;;  %v1273_v4 = vmul.f32 0.5, %v1268_v30 }
 0x8b9   : > { %v1275_v35 = vmul.f32 %v1274_v33, %v1268_v30 }
 0x8bb   : > { %v1276_v36 = vmul.f32 %v1275_v35, %v1268_v30 }
 0x8bd   : > { %v1277_v37 = vadd.f32 %v1276_v36, %v1268_v30 }
 0x8bf   : > { %v1278_v38 = vmul.f32 0.7978846, %v1277_v37 }
 0x8c1   : > { %1811 = vtanh.f32 %v1278_v38 }
 0x8cb   : > { %v1812_v39 = vpop.eup %1811 }
 0x8cc   : > { %v1280_v40 = vadd.f32 1.0, %v1812_v39 }
 0x8ce   : > { %v1281_v41 = vmul.f32 %v1280_v40, %v1273_v4 }
 0x8d0   : > { %v1282_v42 = vpack.c.bf16 %v1281_v41, %v1281_v41 }
 0x8d2   : > { %1283 = vst [vmem:[#allocation7] sm:$0xf] %v1282_v42 }
 0x8d9   : > { %v1284_v43 = vld [vmem:[#allocation7] sm:$0xf] }
 0x8da   : > { %1694 = vmatmul.mubr.bf16.vlgmr.msra.gmra.mrb[20].mxu1 %v1284_v43 }
 0x9ad   : > { %v1383_v45 = vpop.f32.mrb[20].mxu1 }
 0x9ae   : > { %v1390_v46 = vadd.f32 %v1383_v45, %v2156_v63  ;;  %v1695_v47 = vpop.f32.mrb[21].mxu1 }
 0x9af   : > { %v1386_v48 = vpop.f32.mrb[22].mxu1 }
 0x9b0   : > { %v1395_v49 = vadd.f32 %v1539_v44, %v1390_v46  ;;  %v1696_v50 = vpop.f32.mrb[23].mxu1 }
 0x9b2   : > { %1396 = vst.msk [vmem:[%s310_s12] sm:$0xff] %vm327_vm0, %v1395_v49 }
 0x9b3   : > { %1826 = shalt.err (!%p1823_p5)
}
 0x9b4   : > { %s1827_s24 = scalar_lea.hbm %s2220_s20, 128  ;;  %s1831_s12 = scalar_lea.hbm %s2276_s8, 256 }
 0x9b5   : > { %p1828_p6 = scmp.ne.s32.totalorder %s2220_s20, %s1827_s24  ;;  %p1832_p10 = scmp.lt.u32.totalorder %s2220_s20, %s2276_s8 }
 0x9b6   : > { %p1833_p11 = scmp.lt.u32.totalorder %s1831_s12, %s1827_s24  ;;  %p1835_p13 = scmp.lt.u32.totalorder %s1827_s24, %s2220_s20 }
 0x9b7   : > { %p1829_p7 = pnand %p1828_p6, %p1989_p4 }
 0x9b8   : > { %p1834_p12 = por %p1833_p11, %p1832_p10 }
 0x9b9   : > { %p1830_p9 = pneg %p1829_p7 }
 0x9ba   : > { %p1836_p0 = por %p1835_p13, %p1834_p12 }
 0x9bc   : > { %p1837_p1 = pnand %p1836_p0, %p1830_p9 }
 0x9be   : > { %1840 = shalt.err (!%p1837_p1)
}
 0x9bf   : > { %1697 = dma.vmem_to_hbm [thread:$0]  (%p1989_p4), %s2222_s23, 128, %s2220_s20, %s1398_s30  }
 0x9c0 PF: > { %p1703_p2 = scmp.ge.s32.totalorder %s1891_s10, 2  ;;  %s1424_s21 = sand.u32 1, %s1871_s27  }
 0x9c1   : > { %s1425_s22 = scalar_lea.sflag [#allocation9], %s1424_s21 }
 0x9c2   : > { %p1700_p3 = pnand %p1703_p2, %p1996_p8 }
 0x9c4   : > { %1866 = dma.done.wait (!%p1700_p3), %s1425_s22, 128  }
 0x9c5   : > { %1868 = vsyncadd (!%p1700_p3), %s1425_s22, 4294967168  ;;  %s21_s10 = sadd.s32 1, %s1891_s10   ;;  %s2279_s27 = smov %s1875_s28 }
 0x9c6   : > { %p18_p5 = scmp.ge.s32.totalorder %s21_s10, 4   ;;  %s2280_s28 = smov %s1879_s29 }
 0x9c7   : > { %s2281_s29 = smov %s2002_s18  ;;  %s2282_s30 = smov %s1887_s9 }
 0x9c8   : > { %s2283_s9 = smov %s2285_s13  ;;  %20 = sbr.rel (!%p18_p5) target bundleno = 4 (0x4), region = 92 }
 0x9cf   :  { %1430 = vsyncpa [#allocation9], 1 }
 0x9d0   :  { %1432 = vsyncpa [#allocation9 + $0x1], 1 }

</bundles_post_ra>
